<compile_context>
chip_gen: v7x
topology: tpu7x:2x2x1
jax: 0.10.0
libtpu: 0.0.40
codegen_flags: <defaults>
</compile_context>

<pallas_src>
import functools

import jax
import jax.numpy as jnp
from jax.experimental import pallas as pl
from jax.experimental.pallas import tpu as pltpu


def _round_up(n, m):
    return ((n + m - 1) // m) * m


# ---------------------------------------------------------------------------
# Kernel 1: direct NHWC convolution (stride 1) on one row-band of one image.
#   x_ref: (1, 1, band_h, Wp, Cin) f32      w_ref: (kh*kw, Cin, Np) bf16
#   b_ref: (1, 1, Np) f32                   o_ref: (1, tile_oh, Wo_p, Np) f32
# Per-tap bf16 MXU dots accumulate into an f32 register accumulator; the
# bias + ReLU epilogue runs once per output tile.
# ---------------------------------------------------------------------------
def _conv_kernel(x_ref, w_ref, b_ref, o_ref, *, kh, kw, relu):
    tile_oh = o_ref.shape[1]
    wo = o_ref.shape[2]
    np_ = o_ref.shape[3]
    xb = x_ref[0, 0]                              # (band_h, Wp, Cin)
    m = tile_oh * wo
    acc = jnp.zeros((m, np_), jnp.float32)
    for t in range(kh * kw):
        i, j = divmod(t, kw)
        xs = xb[i:i + tile_oh, j:j + wo, :]
        xs = xs.reshape(m, xs.shape[-1]).astype(jnp.bfloat16)
        acc = acc + jnp.dot(xs, w_ref[t], preferred_element_type=jnp.float32)
    acc = acc + b_ref[0]                          # (1, Np) broadcast
    if relu:
        acc = jnp.maximum(acc, 0.0)
    o_ref[0] = acc.reshape(tile_oh, wo, np_)


def _pick_tile_oh(ho, wo_p, cin, kh, kw, np_, budget=8 << 20):
    def est(t):
        band = (t + kh - 1) * (wo_p + kw - 1) * cin * 4
        outb = t * wo_p * np_ * 4
        return 2 * (band + outb)                  # double-buffered
    tile = ho
    while est(tile) > budget and tile % 2 == 0 and tile > 1:
        tile //= 2
    return tile


def conv2d_nhwc(x, w, b, stride=1, padding=0, relu=False):
    """x: (B,H,W,Cin) f32; w: (Cout,Cin,kh,kw) PyTorch layout; b: (Cout,)."""
    B, H, W, Cin = x.shape
    Cout, _, kh, kw = w.shape
    kh, kw = int(kh), int(kw)

    if stride == 2:
        # space-to-depth: stride-2 k-even conv -> stride-1 (k/2) conv on 4*Cin.
        assert kh % 2 == 0 and kw % 2 == 0
        ho_t = (H + 2 * padding - kh) // 2 + 1
        wo_t = (W + 2 * padding - kw) // 2 + 1
        Hp, Wp = H + 2 * padding, W + 2 * padding
        xp = jnp.pad(x, ((0, 0), (padding, padding + Hp % 2),
                         (padding, padding + Wp % 2), (0, 0)))
        Hp += Hp % 2
        Wp += Wp % 2
        xs = xp.reshape(B, Hp // 2, 2, Wp // 2, 2, Cin)
        xs = jnp.transpose(xs, (0, 1, 3, 2, 4, 5)).reshape(B, Hp // 2, Wp // 2, 4 * Cin)
        w2 = w.reshape(Cout, Cin, kh // 2, 2, kw // 2, 2)
        w2 = jnp.transpose(w2, (0, 3, 5, 1, 2, 4)).reshape(Cout, 4 * Cin, kh // 2, kw // 2)
        out = conv2d_nhwc(xs, w2, b, stride=1, padding=0, relu=relu)
        return out[:, :ho_t, :wo_t, :]

    assert stride == 1
    p = padding
    Ho = H + 2 * p - kh + 1
    Wo = W + 2 * p - kw + 1
    Wo_p = _round_up(Wo, 8)                       # lane-dense / aligned reshape
    Np = _round_up(Cout, 128)                     # lane-dense output stores
    Wp_need = Wo_p + kw - 1
    xp = jnp.pad(x, ((0, 0), (p, p), (p, p + (Wp_need - (W + 2 * p))), (0, 0)))

    wm = jnp.transpose(w, (2, 3, 1, 0)).reshape(kh * kw, Cin, Cout)
    wm = jnp.pad(wm, ((0, 0), (0, 0), (0, Np - Cout))).astype(jnp.bfloat16)
    bm = jnp.pad(b, (0, Np - Cout)).reshape(1, 1, Np).astype(jnp.float32)

    tile_oh = _pick_tile_oh(Ho, Wo_p, Cin, kh, kw, Np)
    n_bands = Ho // tile_oh
    band_h = tile_oh + kh - 1
    if n_bands == 1:
        bands = xp[:, None]                       # (B, 1, band_h, Wp_need, Cin)
    else:
        bands = jnp.stack(
            [xp[:, t * tile_oh: t * tile_oh + band_h] for t in range(n_bands)],
            axis=1)

    out = pl.pallas_call(
        functools.partial(_conv_kernel, kh=kh, kw=kw, relu=relu),
        out_shape=jax.ShapeDtypeStruct((B, Ho, Wo_p, Np), jnp.float32),
        grid=(B, n_bands),
        in_specs=[
            pl.BlockSpec((1, 1, band_h, Wp_need, Cin), lambda bi, t: (bi, t, 0, 0, 0)),
            pl.BlockSpec((kh * kw, Cin, Np), lambda bi, t: (0, 0, 0)),
            pl.BlockSpec((1, 1, Np), lambda bi, t: (0, 0, 0)),
        ],
        out_specs=pl.BlockSpec((1, tile_oh, Wo_p, Np), lambda bi, t: (bi, t, 0, 0)),
        compiler_params=pltpu.CompilerParams(
            dimension_semantics=("parallel", "parallel")),
    )(bands, wm, bm)
    return out[:, :, :Wo, :Cout]


def conv_transpose2d_nhwc(x, w, bias, relu=False):
    """ConvTranspose2d(k=4, s=2, p=1) via a single fused 2x2 stride-1 conv
    over the 4 output-parity phases (no zero-insertion, no wasted FLOPs).
    x: (B,H,W,Cin); w: (Cin,Cout,4,4) PyTorch ConvTranspose layout."""
    B, H, W, Cin = x.shape
    _, Cout, kh, kw = w.shape
    assert kh == 4 and kw == 4
    wt = jnp.transpose(w, (1, 0, 2, 3))           # (Cout, Cin, ky, kx)
    phases = []
    for a in (0, 1):                              # output row parity
        for c in (0, 1):                          # output col parity
            ph = wt[:, :, [3 - a, 1 - a], :][:, :, :, [3 - c, 1 - c]]
            phases.append(ph)                     # (Cout, Cin, 2, 2)
    wf = jnp.concatenate(phases, axis=0)          # (4*Cout, Cin, 2, 2)
    bf_ = jnp.tile(bias, 4)
    co = conv2d_nhwc(x, wf, bf_, stride=1, padding=1, relu=relu)  # (B,H+1,W+1,4*Cout)
    co = co.reshape(B, H + 1, W + 1, 2, 2, Cout)
    p00 = co[:, 0:H, 0:W, 0, 0]
    p01 = co[:, 0:H, 1:W + 1, 0, 1]
    p10 = co[:, 1:H + 1, 0:W, 1, 0]
    p11 = co[:, 1:H + 1, 1:W + 1, 1, 1]
    row0 = jnp.stack([p00, p01], axis=3).reshape(B, H, 2 * W, Cout)
    row1 = jnp.stack([p10, p11], axis=3).reshape(B, H, 2 * W, Cout)
    return jnp.stack([row0, row1], axis=2).reshape(B, 2 * H, 2 * W, Cout)


# ---------------------------------------------------------------------------
# Kernel 2: tiled matmul + bias (+ReLU) for the style-MLP linears.
# grid (M, N, K), bf16 operands, f32 VMEM accumulator, epilogue on last K step.
# ---------------------------------------------------------------------------
def _matmul_kernel(x_ref, w_ref, b_ref, o_ref, acc_ref, *, relu):
    k = pl.program_id(2)

    @pl.when(k == 0)
    def _():
        acc_ref[...] = jnp.zeros_like(acc_ref)

    acc_ref[...] += jnp.dot(x_ref[...], w_ref[...],
                            preferred_element_type=jnp.float32)

    @pl.when(k == pl.num_programs(2) - 1)
    def _():
        out = acc_ref[...] + b_ref[...]
        if relu:
            out = jnp.maximum(out, 0.0)
        o_ref[...] = out


def matmul_bias(x, w, b, relu=False):
    M, K = x.shape
    N = w.shape[1]
    tm = min(256, _round_up(M, 8))
    Mp = _round_up(M, tm)
    tk = min(512, _round_up(K, 128))
    Kp = _round_up(K, tk)
    tn = min(256, _round_up(N, 128))
    Np = _round_up(N, tn)
    xp = jnp.pad(x, ((0, Mp - M), (0, Kp - K))).astype(jnp.bfloat16)
    wp = jnp.pad(w, ((0, Kp - K), (0, Np - N))).astype(jnp.bfloat16)
    bp = jnp.pad(b, (0, Np - N)).reshape(1, Np).astype(jnp.float32)
    out = pl.pallas_call(
        functools.partial(_matmul_kernel, relu=relu),
        out_shape=jax.ShapeDtypeStruct((Mp, Np), jnp.float32),
        grid=(Mp // tm, Np // tn, Kp // tk),
        in_specs=[
            pl.BlockSpec((tm, tk), lambda i, j, k: (i, k)),
            pl.BlockSpec((tk, tn), lambda i, j, k: (k, j)),
            pl.BlockSpec((1, tn), lambda i, j, k: (0, j)),
        ],
        out_specs=pl.BlockSpec((tm, tn), lambda i, j, k: (i, j)),
        scratch_shapes=[pltpu.VMEM((tm, tn), jnp.float32)],
        compiler_params=pltpu.CompilerParams(
            dimension_semantics=("parallel", "parallel", "arbitrary")),
    )(xp, wp, bp)
    return out[:M, :N]


# ---------------------------------------------------------------------------
# Kernel 3: DirectHorizontalLineFilter on a whole (H+4, W, C) NHWC slab.
# Input is replicate-padded by 2 rows on each side in glue; vertical 5-tap
# mean, per-row std (ddof=1), sigmoid mask, mask smoothing, blend, optional
# tanh all happen in-kernel.  One grid step per batch element.
# ---------------------------------------------------------------------------
def _line_filter_kernel(xp_ref, o_ref, *, strength, apply_tanh):
    H = o_ref.shape[1]
    xp = xp_ref[0]                                # (H+4, W, C)
    Wd = xp.shape[1]
    x = xp[2:H + 2]
    vsm = (xp[0:H] + xp[1:H + 1] + xp[2:H + 2] + xp[3:H + 3] + xp[4:H + 4]) * 0.2
    mean = jnp.mean(xp, axis=1, keepdims=True)    # (H+4, 1, C)
    var = jnp.sum((xp - mean) ** 2, axis=1, keepdims=True) * (1.0 / (Wd - 1))
    std = jnp.sqrt(var)
    mp = jax.nn.sigmoid((0.05 - std) * 10.0)      # replicate-padded mask rows
    mask = (mp[0:H] + mp[1:H + 1] + mp[2:H + 2] + mp[3:H + 3] + mp[4:H + 4]) * 0.2
    wm = mask * strength
    out = x * (1.0 - wm) + vsm * wm
    if apply_tanh:
        out = jnp.tanh(out)
    o_ref[0] = out


def line_filter_nhwc(x, strength, apply_tanh=False):
    B, H, W, C = x.shape
    xp = jnp.pad(x, ((0, 0), (2, 2), (0, 0), (0, 0)), mode='edge')
    return pl.pallas_call(
        functools.partial(_line_filter_kernel, strength=strength,
                          apply_tanh=apply_tanh),
        out_shape=jax.ShapeDtypeStruct((B, H, W, C), jnp.float32),
        grid=(B,),
        in_specs=[pl.BlockSpec((1, H + 4, W, C), lambda bi: (bi, 0, 0, 0))],
        out_specs=pl.BlockSpec((1, H, W, C), lambda bi: (bi, 0, 0, 0)),
        compiler_params=pltpu.CompilerParams(dimension_semantics=("parallel",)),
    )(xp)


# ---------------------------------------------------------------------------
# Kernel 4: SAGAN self-attention, flash-style (online softmax over KV blocks).
# out = gamma * softmax(q k^T) v + x, per batch element.
# ---------------------------------------------------------------------------
def _attn_kernel(q_ref, k_ref, v_ref, x_ref, o_ref, m_sc, l_sc, acc_sc, *, gamma):
    ki = pl.program_id(2)

    @pl.when(ki == 0)
    def _():
        m_sc[...] = jnp.full_like(m_sc, -1e30)
        l_sc[...] = jnp.zeros_like(l_sc)
        acc_sc[...] = jnp.zeros_like(acc_sc)

    q = q_ref[0].astype(jnp.bfloat16)             # (tq, C8)
    kk = k_ref[0].astype(jnp.bfloat16)            # (tkv, C8)
    v = v_ref[0].astype(jnp.bfloat16)             # (tkv, C)
    s = jax.lax.dot_general(q, kk, (((1,), (1,)), ((), ())),
                            preferred_element_type=jnp.float32)  # (tq, tkv)
    m_prev = m_sc[...]
    m_new = jnp.maximum(m_prev, jnp.max(s, axis=-1, keepdims=True))
    alpha = jnp.exp(m_prev - m_new)
    p = jnp.exp(s - m_new)
    l_sc[...] = alpha * l_sc[...] + jnp.sum(p, axis=-1, keepdims=True)
    acc_sc[...] = alpha * acc_sc[...] + jnp.dot(
        p.astype(jnp.bfloat16), v, preferred_element_type=jnp.float32)
    m_sc[...] = m_new

    @pl.when(ki == pl.num_programs(2) - 1)
    def _():
        inv_l = pl.reciprocal(l_sc[...], approx=True)
        o_ref[0] = gamma * (acc_sc[...] * inv_l) + x_ref[0]


def _seq_tile(n):
    if n <= 1024:
        return n
    for t in (512, 256, 128):
        if n % t == 0:
            return t
    return n


def self_attention_nhwc(x, params, gamma):
    if gamma == 0.0:          # torch-init value: gamma*attn + x == x, skip all
        return x
    B, H, W, C = x.shape
    C8 = max(C // 8, 1)
    # fused q/k/v 1x1 conv (single pallas_call, lane-dense Cout)
    qkv_w = jnp.concatenate(
        [params['attn_q_w'], params['attn_k_w'], params['attn_v_w']], axis=0)
    qkv_b = jnp.concatenate(
        [params['attn_q_b'], params['attn_k_b'], params['attn_v_b']], axis=0)
    qkv = conv2d_nhwc(x, qkv_w, qkv_b, stride=1, padding=0, relu=False)
    q = qkv[..., :C8]
    k = qkv[..., C8:2 * C8]
    v = qkv[..., 2 * C8:2 * C8 + C]
    N = H * W
    q_b = q.reshape(B, N, C8)
    k_b = k.reshape(B, N, C8)
    v_b = v.reshape(B, N, C)
    x_b = x.reshape(B, N, C)
    tq = _seq_tile(N)
    tkv = _seq_tile(N)
    out = pl.pallas_call(
        functools.partial(_attn_kernel, gamma=gamma),
        out_shape=jax.ShapeDtypeStruct((B, N, C), jnp.float32),
        grid=(B, N // tq, N // tkv),
        in_specs=[
            pl.BlockSpec((1, tq, C8), lambda b, qi, ki: (b, qi, 0)),
            pl.BlockSpec((1, tkv, C8), lambda b, qi, ki: (b, ki, 0)),
            pl.BlockSpec((1, tkv, C), lambda b, qi, ki: (b, ki, 0)),
            pl.BlockSpec((1, tq, C), lambda b, qi, ki: (b, qi, 0)),
        ],
        out_specs=pl.BlockSpec((1, tq, C), lambda b, qi, ki: (b, qi, 0)),
        scratch_shapes=[
            pltpu.VMEM((tq, 1), jnp.float32),
            pltpu.VMEM((tq, 1), jnp.float32),
            pltpu.VMEM((tq, C), jnp.float32),
        ],
        compiler_params=pltpu.CompilerParams(
            dimension_semantics=("parallel", "parallel", "arbitrary")),
    )(q_b, k_b, v_b, x_b)
    return out.reshape(B, H, W, C)


# ---------------------------------------------------------------------------
# Glue: adaptive average pool (nn.AdaptiveAvgPool2d semantics), NHWC.
# ---------------------------------------------------------------------------
def adaptive_avg_pool_nhwc(x, oh, ow):
    B, H, W, C = x.shape
    rows = []
    for i in range(oh):
        h0 = (i * H) // oh
        h1 = -(-((i + 1) * H) // oh)
        cols = []
        for j in range(ow):
            w0 = (j * W) // ow
            w1 = -(-((j + 1) * W) // ow)
            cols.append(jnp.mean(x[:, h0:h1, w0:w1, :], axis=(1, 2)))  # (B, C)
        rows.append(jnp.stack(cols, axis=1))                           # (B, ow, C)
    return jnp.stack(rows, axis=1)                                     # (B, oh, ow, C)


# ---------------------------------------------------------------------------
# Parameter init (deterministic; shapes follow the PyTorch module __init__).
# Conv weights: (Cout, Cin, kh, kw); ConvTranspose: (Cin, Cout, 4, 4);
# Linear weights stored as (in, out) for direct x @ W.
# ---------------------------------------------------------------------------
def init_params(key, base_filters=16):
    bf = base_filters
    keys = iter(jax.random.split(key, 64))

    def nrm(shape, scale=0.05):
        return jax.random.normal(next(keys), shape, jnp.float32) * scale

    p = {}
    p['enc1_w'] = nrm((bf, 2, 3, 3));          p['enc1_b'] = nrm((bf,), 0.01)
    p['enc2_w'] = nrm((2 * bf, bf, 4, 4));     p['enc2_b'] = nrm((2 * bf,), 0.01)
    p['enc3_w'] = nrm((4 * bf, 2 * bf, 4, 4)); p['enc3_b'] = nrm((4 * bf,), 0.01)
    p['se1_w'] = nrm((bf, 3, 3, 3));           p['se1_b'] = nrm((bf,), 0.01)
    p['se2_w'] = nrm((2 * bf, bf, 4, 4));      p['se2_b'] = nrm((2 * bf,), 0.01)
    p['se3_w'] = nrm((4 * bf, 2 * bf, 4, 4));  p['se3_b'] = nrm((4 * bf,), 0.01)
    p['fc1_w'] = nrm((4 * bf * 8 * 8, 4 * bf), 0.01); p['fc1_b'] = nrm((4 * bf,), 0.01)
    p['fc2_w'] = nrm((4 * bf, 4 * bf));        p['fc2_b'] = nrm((4 * bf,), 0.01)
    p['mod_w'] = nrm((4 * bf, 8 * bf, 3, 3));  p['mod_b'] = nrm((4 * bf,), 0.01)
    p['attn_q_w'] = nrm((4 * bf // 8, 4 * bf, 1, 1)); p['attn_q_b'] = nrm((4 * bf // 8,), 0.01)
    p['attn_k_w'] = nrm((4 * bf // 8, 4 * bf, 1, 1)); p['attn_k_b'] = nrm((4 * bf // 8,), 0.01)
    p['attn_v_w'] = nrm((4 * bf, 4 * bf, 1, 1));      p['attn_v_b'] = nrm((4 * bf,), 0.01)
    # SelfAttention gamma (torch init = 0.0 -> attention is a no-op and is
    # short-circuited).  Set nonzero here so the attention kernel is exercised.
    p['attn_gamma'] = 0.1
    p['bott_w'] = nrm((4 * bf, 4 * bf, 3, 3)); p['bott_b'] = nrm((4 * bf,), 0.01)
    p['dec3_w'] = nrm((8 * bf, 2 * bf, 4, 4)); p['dec3_b'] = nrm((2 * bf,), 0.01)
    p['dec2_w'] = nrm((4 * bf, bf, 4, 4));     p['dec2_b'] = nrm((bf,), 0.01)
    p['dec1_w'] = nrm((3, 2 * bf, 3, 3));      p['dec1_b'] = nrm((3,), 0.01)
    return p


# ---------------------------------------------------------------------------
# Forward pass (mirrors SketchDepthColorizer.forward, with_style_encoder=True).
# Boundary tensors are PyTorch-style NCHW; internals are NHWC.
# ---------------------------------------------------------------------------
def forward(params, sketch, depth, style_image=None):
    x = jnp.concatenate([sketch, depth], axis=1)
    x = jnp.transpose(x, (0, 2, 3, 1))                         # NCHW -> NHWC
    e1 = conv2d_nhwc(x, params['enc1_w'], params['enc1_b'], 1, 1, relu=True)
    e2 = conv2d_nhwc(e1, params['enc2_w'], params['enc2_b'], 2, 1, relu=True)
    e3 = conv2d_nhwc(e2, params['enc3_w'], params['enc3_b'], 2, 1, relu=True)
    e3 = line_filter_nhwc(e3, strength=0.8)

    if style_image is not None:
        s = jnp.transpose(style_image, (0, 2, 3, 1))
        s1 = conv2d_nhwc(s, params['se1_w'], params['se1_b'], 1, 1, relu=True)
        s2 = conv2d_nhwc(s1, params['se2_w'], params['se2_b'], 2, 1, relu=True)
        s3 = conv2d_nhwc(s2, params['se3_w'], params['se3_b'], 2, 1, relu=True)
        pooled = adaptive_avg_pool_nhwc(s3, 8, 8)              # (B, 8, 8, 4bf)
        flat = jnp.transpose(pooled, (0, 3, 1, 2)).reshape(pooled.shape[0], -1)
        sf = matmul_bias(flat, params['fc1_w'], params['fc1_b'], relu=True)
        sf = matmul_bias(sf, params['fc2_w'], params['fc2_b'], relu=True)
        Bs, Cf = sf.shape
        h, w = e3.shape[1], e3.shape[2]
        style_feat = jnp.broadcast_to(sf.reshape(Bs, 1, 1, Cf), (Bs, h, w, Cf))
        e3s = conv2d_nhwc(jnp.concatenate([e3, style_feat], axis=-1),
                          params['mod_w'], params['mod_b'], 1, 1, relu=True)
        e3 = e3 * 0.99 + e3s * 0.01

    e3 = self_attention_nhwc(e3, params, gamma=params['attn_gamma'])
    bneck = conv2d_nhwc(e3, params['bott_w'], params['bott_b'], 1, 1, relu=True)
    d3 = conv_transpose2d_nhwc(jnp.concatenate([bneck, e3], axis=-1),
                               params['dec3_w'], params['dec3_b'], relu=True)
    d2 = conv_transpose2d_nhwc(jnp.concatenate([d3, e2], axis=-1),
                               params['dec2_w'], params['dec2_b'], relu=True)
    d2 = line_filter_nhwc(d2, strength=0.8)
    pre_out = conv2d_nhwc(jnp.concatenate([d2, e1], axis=-1),
                          params['dec1_w'], params['dec1_b'], 1, 1, relu=False)
    d1 = line_filter_nhwc(pre_out, strength=0.9, apply_tanh=True)
    return jnp.transpose(d1, (0, 3, 1, 2))                     # NHWC -> NCHW


if __name__ == "__main__":
    key = jax.random.PRNGKey(0)
    k_sk, k_dp, k_st, k_par = jax.random.split(key, 4)
    B, H, W = 2, 16, 16
    sketch = jax.random.normal(k_sk, (B, 1, H, W), jnp.float32)
    depth = jax.random.normal(k_dp, (B, 1, H, W), jnp.float32)
    style = jax.random.normal(k_st, (B, 3, H, W), jnp.float32)
    params = init_params(k_par, base_filters=16)

    out = forward(params, sketch, depth, style)
    out = jax.block_until_ready(out)
    assert out.shape == (B, 3, H, W), out.shape
    assert bool(jnp.all(jnp.isfinite(out)))
    print("KERNEL_OK")
</pallas_src>

<mosaic_0001>
module attributes {stable_mosaic.version = 11 : i64} {
  func.func @_conv_kernel(%arg0: i32, %arg1: i32, %arg2: memref<1x1x18x18x2xf32, #tpu.memory_space<vmem>>, %arg3: memref<9x2x128xbf16, #tpu.memory_space<vmem>>, %arg4: memref<1x1x128xf32, #tpu.memory_space<vmem>>, %arg5: memref<1x16x16x128xf32, #tpu.memory_space<vmem>>) attributes {dimension_semantics = [#tpu.dimension_semantics<parallel>, #tpu.dimension_semantics<parallel>], iteration_bounds = array<i64: 2, 1>, scalar_prefetch = 0 : i64, scratch_operands = 0 : i64, tpu.core_type = #tpu.core_type<tc>, window_params = [{transform_indices = @transform_0, window_bounds = array<i64: 1, 1, 18, 18, 2>}, {pipeline_mode = #tpu.pipeline_mode<synchronous>, transform_indices = @transform_1, window_bounds = array<i64: 9, 2, 128>}, {pipeline_mode = #tpu.pipeline_mode<synchronous>, transform_indices = @transform_2, window_bounds = array<i64: 1, 1, 128>}, {transform_indices = @transform_3, window_bounds = array<i64: 1, 16, 16, 128>}]} {
    %c0 = arith.constant 0 : index
    %c0_0 = arith.constant 0 : index
    %c0_1 = arith.constant 0 : index
    %c0_2 = arith.constant 0 : index
    %c0_3 = arith.constant 0 : index
    %0 = vector.load %arg2[%c0, %c0_0, %c0_1, %c0_2, %c0_3] : memref<1x1x18x18x2xf32, #tpu.memory_space<vmem>>, vector<1x1x18x18x2xf32>
    %1 = vector.shape_cast %0 : vector<1x1x18x18x2xf32> to vector<18x18x2xf32>
    %cst = arith.constant 0.000000e+00 : f32
    %2 = vector.broadcast %cst : f32 to vector<256x128xf32>
    %3 = vector.extract_strided_slice %1 {offsets = [0, 0, 0], sizes = [16, 16, 2], strides = [1, 1, 1]} : vector<18x18x2xf32> to vector<16x16x2xf32>
    %4 = vector.shape_cast %3 : vector<16x16x2xf32> to vector<256x2xf32>
    %5 = arith.truncf %4 : vector<256x2xf32> to vector<256x2xbf16>
    %c0_4 = arith.constant 0 : index
    %c0_5 = arith.constant 0 : index
    %c0_6 = arith.constant 0 : index
    %6 = vector.load %arg3[%c0_4, %c0_5, %c0_6] : memref<9x2x128xbf16, #tpu.memory_space<vmem>>, vector<1x2x128xbf16>
    %7 = vector.shape_cast %6 : vector<1x2x128xbf16> to vector<2x128xbf16>
    %cst_7 = arith.constant dense<0.000000e+00> : vector<256x128xf32>
    %8 = tpu.matmul %5, %7, %cst_7 {dimension_numbers = #tpu.dot_dimension_numbers<[1], [0], [0], [1], [0, 0, 1, 1], [], []>} : vector<256x2xbf16>, vector<2x128xbf16>, vector<256x128xf32> -> vector<256x128xf32>
    %9 = arith.addf %2, %8 : vector<256x128xf32>
    %10 = vector.extract_strided_slice %1 {offsets = [0, 1, 0], sizes = [16, 16, 2], strides = [1, 1, 1]} : vector<18x18x2xf32> to vector<16x16x2xf32>
    %11 = vector.shape_cast %10 : vector<16x16x2xf32> to vector<256x2xf32>
    %12 = arith.truncf %11 : vector<256x2xf32> to vector<256x2xbf16>
    %c1 = arith.constant 1 : index
    %c0_8 = arith.constant 0 : index
    %c0_9 = arith.constant 0 : index
    %13 = vector.load %arg3[%c1, %c0_8, %c0_9] : memref<9x2x128xbf16, #tpu.memory_space<vmem>>, vector<1x2x128xbf16>
    %14 = vector.shape_cast %13 : vector<1x2x128xbf16> to vector<2x128xbf16>
    %cst_10 = arith.constant dense<0.000000e+00> : vector<256x128xf32>
    %15 = tpu.matmul %12, %14, %cst_10 {dimension_numbers = #tpu.dot_dimension_numbers<[1], [0], [0], [1], [0, 0, 1, 1], [], []>} : vector<256x2xbf16>, vector<2x128xbf16>, vector<256x128xf32> -> vector<256x128xf32>
    %16 = arith.addf %9, %15 : vector<256x128xf32>
    %17 = vector.extract_strided_slice %1 {offsets = [0, 2, 0], sizes = [16, 16, 2], strides = [1, 1, 1]} : vector<18x18x2xf32> to vector<16x16x2xf32>
    %18 = vector.shape_cast %17 : vector<16x16x2xf32> to vector<256x2xf32>
    %19 = arith.truncf %18 : vector<256x2xf32> to vector<256x2xbf16>
    %c2 = arith.constant 2 : index
    %c0_11 = arith.constant 0 : index
    %c0_12 = arith.constant 0 : index
    %20 = vector.load %arg3[%c2, %c0_11, %c0_12] : memref<9x2x128xbf16, #tpu.memory_space<vmem>>, vector<1x2x128xbf16>
    %21 = vector.shape_cast %20 : vector<1x2x128xbf16> to vector<2x128xbf16>
    %cst_13 = arith.constant dense<0.000000e+00> : vector<256x128xf32>
    %22 = tpu.matmul %19, %21, %cst_13 {dimension_numbers = #tpu.dot_dimension_numbers<[1], [0], [0], [1], [0, 0, 1, 1], [], []>} : vector<256x2xbf16>, vector<2x128xbf16>, vector<256x128xf32> -> vector<256x128xf32>
    %23 = arith.addf %16, %22 : vector<256x128xf32>
    %24 = vector.extract_strided_slice %1 {offsets = [1, 0, 0], sizes = [16, 16, 2], strides = [1, 1, 1]} : vector<18x18x2xf32> to vector<16x16x2xf32>
    %25 = vector.shape_cast %24 : vector<16x16x2xf32> to vector<256x2xf32>
    %26 = arith.truncf %25 : vector<256x2xf32> to vector<256x2xbf16>
    %c3 = arith.constant 3 : index
    %c0_14 = arith.constant 0 : index
    %c0_15 = arith.constant 0 : index
    %27 = vector.load %arg3[%c3, %c0_14, %c0_15] : memref<9x2x128xbf16, #tpu.memory_space<vmem>>, vector<1x2x128xbf16>
    %28 = vector.shape_cast %27 : vector<1x2x128xbf16> to vector<2x128xbf16>
    %cst_16 = arith.constant dense<0.000000e+00> : vector<256x128xf32>
    %29 = tpu.matmul %26, %28, %cst_16 {dimension_numbers = #tpu.dot_dimension_numbers<[1], [0], [0], [1], [0, 0, 1, 1], [], []>} : vector<256x2xbf16>, vector<2x128xbf16>, vector<256x128xf32> -> vector<256x128xf32>
    %30 = arith.addf %23, %29 : vector<256x128xf32>
    %31 = vector.extract_strided_slice %1 {offsets = [1, 1, 0], sizes = [16, 16, 2], strides = [1, 1, 1]} : vector<18x18x2xf32> to vector<16x16x2xf32>
    %32 = vector.shape_cast %31 : vector<16x16x2xf32> to vector<256x2xf32>
    %33 = arith.truncf %32 : vector<256x2xf32> to vector<256x2xbf16>
    %c4 = arith.constant 4 : index
    %c0_17 = arith.constant 0 : index
    %c0_18 = arith.constant 0 : index
    %34 = vector.load %arg3[%c4, %c0_17, %c0_18] : memref<9x2x128xbf16, #tpu.memory_space<vmem>>, vector<1x2x128xbf16>
    %35 = vector.shape_cast %34 : vector<1x2x128xbf16> to vector<2x128xbf16>
    %cst_19 = arith.constant dense<0.000000e+00> : vector<256x128xf32>
    %36 = tpu.matmul %33, %35, %cst_19 {dimension_numbers = #tpu.dot_dimension_numbers<[1], [0], [0], [1], [0, 0, 1, 1], [], []>} : vector<256x2xbf16>, vector<2x128xbf16>, vector<256x128xf32> -> vector<256x128xf32>
    %37 = arith.addf %30, %36 : vector<256x128xf32>
    %38 = vector.extract_strided_slice %1 {offsets = [1, 2, 0], sizes = [16, 16, 2], strides = [1, 1, 1]} : vector<18x18x2xf32> to vector<16x16x2xf32>
    %39 = vector.shape_cast %38 : vector<16x16x2xf32> to vector<256x2xf32>
    %40 = arith.truncf %39 : vector<256x2xf32> to vector<256x2xbf16>
    %c5 = arith.constant 5 : index
    %c0_20 = arith.constant 0 : index
    %c0_21 = arith.constant 0 : index
    %41 = vector.load %arg3[%c5, %c0_20, %c0_21] : memref<9x2x128xbf16, #tpu.memory_space<vmem>>, vector<1x2x128xbf16>
    %42 = vector.shape_cast %41 : vector<1x2x128xbf16> to vector<2x128xbf16>
    %cst_22 = arith.constant dense<0.000000e+00> : vector<256x128xf32>
    %43 = tpu.matmul %40, %42, %cst_22 {dimension_numbers = #tpu.dot_dimension_numbers<[1], [0], [0], [1], [0, 0, 1, 1], [], []>} : vector<256x2xbf16>, vector<2x128xbf16>, vector<256x128xf32> -> vector<256x128xf32>
    %44 = arith.addf %37, %43 : vector<256x128xf32>
    %45 = vector.extract_strided_slice %1 {offsets = [2, 0, 0], sizes = [16, 16, 2], strides = [1, 1, 1]} : vector<18x18x2xf32> to vector<16x16x2xf32>
    %46 = vector.shape_cast %45 : vector<16x16x2xf32> to vector<256x2xf32>
    %47 = arith.truncf %46 : vector<256x2xf32> to vector<256x2xbf16>
    %c6 = arith.constant 6 : index
    %c0_23 = arith.constant 0 : index
    %c0_24 = arith.constant 0 : index
    %48 = vector.load %arg3[%c6, %c0_23, %c0_24] : memref<9x2x128xbf16, #tpu.memory_space<vmem>>, vector<1x2x128xbf16>
    %49 = vector.shape_cast %48 : vector<1x2x128xbf16> to vector<2x128xbf16>
    %cst_25 = arith.constant dense<0.000000e+00> : vector<256x128xf32>
    %50 = tpu.matmul %47, %49, %cst_25 {dimension_numbers = #tpu.dot_dimension_numbers<[1], [0], [0], [1], [0, 0, 1, 1], [], []>} : vector<256x2xbf16>, vector<2x128xbf16>, vector<256x128xf32> -> vector<256x128xf32>
    %51 = arith.addf %44, %50 : vector<256x128xf32>
    %52 = vector.extract_strided_slice %1 {offsets = [2, 1, 0], sizes = [16, 16, 2], strides = [1, 1, 1]} : vector<18x18x2xf32> to vector<16x16x2xf32>
    %53 = vector.shape_cast %52 : vector<16x16x2xf32> to vector<256x2xf32>
    %54 = arith.truncf %53 : vector<256x2xf32> to vector<256x2xbf16>
    %c7 = arith.constant 7 : index
    %c0_26 = arith.constant 0 : index
    %c0_27 = arith.constant 0 : index
    %55 = vector.load %arg3[%c7, %c0_26, %c0_27] : memref<9x2x128xbf16, #tpu.memory_space<vmem>>, vector<1x2x128xbf16>
    %56 = vector.shape_cast %55 : vector<1x2x128xbf16> to vector<2x128xbf16>
    %cst_28 = arith.constant dense<0.000000e+00> : vector<256x128xf32>
    %57 = tpu.matmul %54, %56, %cst_28 {dimension_numbers = #tpu.dot_dimension_numbers<[1], [0], [0], [1], [0, 0, 1, 1], [], []>} : vector<256x2xbf16>, vector<2x128xbf16>, vector<256x128xf32> -> vector<256x128xf32>
    %58 = arith.addf %51, %57 : vector<256x128xf32>
    %59 = vector.extract_strided_slice %1 {offsets = [2, 2, 0], sizes = [16, 16, 2], strides = [1, 1, 1]} : vector<18x18x2xf32> to vector<16x16x2xf32>
    %60 = vector.shape_cast %59 : vector<16x16x2xf32> to vector<256x2xf32>
    %61 = arith.truncf %60 : vector<256x2xf32> to vector<256x2xbf16>
    %c8 = arith.constant 8 : index
    %c0_29 = arith.constant 0 : index
    %c0_30 = arith.constant 0 : index
    %62 = vector.load %arg3[%c8, %c0_29, %c0_30] : memref<9x2x128xbf16, #tpu.memory_space<vmem>>, vector<1x2x128xbf16>
    %63 = vector.shape_cast %62 : vector<1x2x128xbf16> to vector<2x128xbf16>
    %cst_31 = arith.constant dense<0.000000e+00> : vector<256x128xf32>
    %64 = tpu.matmul %61, %63, %cst_31 {dimension_numbers = #tpu.dot_dimension_numbers<[1], [0], [0], [1], [0, 0, 1, 1], [], []>} : vector<256x2xbf16>, vector<2x128xbf16>, vector<256x128xf32> -> vector<256x128xf32>
    %65 = arith.addf %58, %64 : vector<256x128xf32>
    %c0_32 = arith.constant 0 : index
    %c0_33 = arith.constant 0 : index
    %c0_34 = arith.constant 0 : index
    %66 = vector.load %arg4[%c0_32, %c0_33, %c0_34] : memref<1x1x128xf32, #tpu.memory_space<vmem>>, vector<1x1x128xf32>
    %67 = vector.shape_cast %66 : vector<1x1x128xf32> to vector<1x128xf32>
    %68 = vector.broadcast %67 : vector<1x128xf32> to vector<256x128xf32>
    %69 = arith.addf %65, %68 : vector<256x128xf32>
    %cst_35 = arith.constant 0.000000e+00 : f32
    %70 = vector.broadcast %cst_35 : f32 to vector<256x128xf32>
    %71 = arith.maximumf %69, %70 : vector<256x128xf32>
    %72 = vector.shape_cast %71 : vector<256x128xf32> to vector<16x16x128xf32>
    %c0_36 = arith.constant 0 : index
    %c0_37 = arith.constant 0 : index
    %c0_38 = arith.constant 0 : index
    %c0_39 = arith.constant 0 : index
    %73 = vector.load %arg5[%c0_36, %c0_37, %c0_38, %c0_39] : memref<1x16x16x128xf32, #tpu.memory_space<vmem>>, vector<1x16x16x128xf32>
    %74 = vector.shape_cast %73 : vector<1x16x16x128xf32> to vector<16x16x128xf32>
    %75 = vector.shape_cast %72 : vector<16x16x128xf32> to vector<1x16x16x128xf32>
    tpu.vector_store %arg5[%c0_36, %c0_37, %c0_38, %c0_39], %75 {strides = array<i32>} : memref<1x16x16x128xf32, #tpu.memory_space<vmem>>, vector<1x16x16x128xf32>,
    return
  }
  func.func @transform_0(%arg0: i32, %arg1: i32) -> (i32, i32, i32, i32, i32) {
    %c0_i32 = arith.constant 0 : i32
    %c0_i32_0 = arith.constant 0 : i32
    %c0_i32_1 = arith.constant 0 : i32
    %c0_i32_2 = arith.constant 0 : i32
    return %arg0, %arg1, %c0_i32, %c0_i32_0, %c0_i32_1 : i32, i32, i32, i32, i32
  }
  func.func @transform_1(%arg0: i32, %arg1: i32) -> (i32, i32, i32) {
    %c0_i32 = arith.constant 0 : i32
    %c0_i32_0 = arith.constant 0 : i32
    %c0_i32_1 = arith.constant 0 : i32
    %c0_i32_2 = arith.constant 0 : i32
    return %c0_i32, %c0_i32_0, %c0_i32_1 : i32, i32, i32
  }
  func.func @transform_2(%arg0: i32, %arg1: i32) -> (i32, i32, i32) {
    %c0_i32 = arith.constant 0 : i32
    %c0_i32_0 = arith.constant 0 : i32
    %c0_i32_1 = arith.constant 0 : i32
    %c0_i32_2 = arith.constant 0 : i32
    return %c0_i32, %c0_i32_0, %c0_i32_1 : i32, i32, i32
  }
  func.func @transform_3(%arg0: i32, %arg1: i32) -> (i32, i32, i32, i32) {
    %c0_i32 = arith.constant 0 : i32
    %c0_i32_0 = arith.constant 0 : i32
    %c0_i32_1 = arith.constant 0 : i32
    return %arg0, %arg1, %c0_i32, %c0_i32_0 : i32, i32, i32, i32
  }
}

</mosaic_0001>

<bundles_post_ra>
// kernel: tpu_custom_call.1
= control target key start
LH: loop header
LB: loop body
LE: loop exit
PB: predicated region body
PF: predicated region fallthrough
CT: control target
= control target key end

     0   :  { %8 = vsyncpa [#allocation3], 0  ;;  %s4770_s0 = inlined_call_operand.vmem [shape: f32[2,1,18,18,2], index: 0, kind: input, shape index: {}]   ;;  %s4771_s1 = inlined_call_operand.vmem [shape: bf16[9,2,128], index: 1, kind: input, shape index: {}]   ;;  %s4772_s2 = inlined_call_operand.vmem [shape: f32[1,1,128], index: 2, kind: input, shape index: {}]   ;;  %s4773_s3 = inlined_call_operand.hbm [shape: f32[2,16,16,128], index: 3, kind: output, shape index: {}]  }
   0x1   :  { %10 = vsyncpa [#allocation3 + $0x1], 0  ;;  %s3752_s12 = smov 0   ;;  %s3754_s13 = smov 0  }
   0x2   :  { %s3756_s14 = smov 0   ;;  %s3758_s15 = smov 0  }
   0x3   :  { %s3760_s16 = smov 0   ;;  %s3762_s17 = smov 0  }
   0x4 LB: > { %s2698_s18 = sadd.s32 4294967295, %s3727_s17   ;;  %s2699_s19 = sadd.s32 4294967294, %s3727_s17   ;;  %s3727_s17 = sphi %s3762_s17, %s16_s17   ;;  %s3723_s16 = sphi %s3760_s16, %s4839_s16   ;;  %s3719_s15 = sphi %s3758_s15, %s4838_s15   ;;  %s3715_s14 = sphi %s3756_s14, %s4837_s14   ;;  %s3711_s13 = sphi %s3754_s13, %s4836_s13   ;;  %s3707_s12 = sphi %s3752_s12, %s4835_s12  }
   0x5   : > { %s28_s20 = sadd.s32 1, %s3723_s16  ;;  %s107_s21 = sadd.s32 1, %s3715_s14 }
   0x6   : > { %p30_p0 = scmp.ge.s32.totalorder %s28_s20, 2  ;;  %p117_p1 = scmp.ne.s32.totalorder %s3715_s14, %s3711_s13 }
   0x7   : > { %p118_p2 = scmp.eq.s32.totalorder %s2698_s18, 1  ;;  %p123_p3 = scmp.ne.s32.totalorder %s3711_s13, %s3707_s12 }
   0x8   : > { %s4841_s20 = smov (%p30_p0, %s28_s20), 0  ;;  %p124_p5 = scmp.eq.s32.totalorder %s2699_s19, 1 }
   0x9   : > { %p3792_p4 = por %p118_p2, %p117_p1  ;;  %s102_s23 = ssub.s32 %s3723_s16, %s4841_s20 }
   0xa   : > { %p2702_p6 = scmp.ge.s32.totalorder %s3727_s17, 1  ;;  %p105_p7 = scmp.eq.s32.totalorder %s102_s23, 0 }
   0xb   : > { %p3799_p8 = por %p124_p5, %p123_p3  ;;  %p160_p9 = scmp.lt.s32.totalorder %s3727_s17, 3 }
   0xc   : > { %s3805_s25 = scalar_select %p105_p7, %s3715_s14, %s107_s21  }
   0xd   : > { %p161_p10 = pnand %p2702_p6, %p160_p9 }
   0xf   : > { %164 = sbr.rel (%p161_p10) target bundleno = 555 (0x22b), region = 32 }
  0x16   : > { %v2705_v0 = vld [vmem:[%s4771_s1 + $0x1] sm:$0x1]  ;;  %vm498_vm0 = vcmask 1040384   ;;  %v3813_v1 = vld [vmem:[%s4771_s1 + $0x4] sm:$0x1]  ;;  %p188_p11 = scmp.lt.s32.totalorder %s3719_s15, 1 }
  0x17   : > { %4801 = vst [vmem:[#allocation5_spill] sm:$0xff] %v3813_v1  ;;  %3581 = vmatprep.subr.msk.bf16.mxu1 %vm498_vm0, %v2705_v0  ;;  %3585 = vmatprep.subr.msk.bf16.mxu0 %vm498_vm0, %v3813_v1  ;;  %v500_v2 = vsel %vm498_vm0, %v2705_v0, 0  ;;  %v3822_v3 = vsel %vm498_vm0, %v3813_v1, 0  ;;  %v269_v4 = vld [vmem:[%s4771_s1] sm:$0x1]  ;;  %vm318_vm1 = vcmask 1046528  }
  0x18   : > { %4802 = vst [vmem:[#allocation6_spill] sm:$0xff] %v3822_v3  ;;  %3018 = vmatpush3.bf16.msra.mxu1 %v500_v2  ;;  %3154 = vmatpush3.bf16.msra.mxu0 %v3822_v3  ;;  %s189_s5 = scalar_select %p188_p11, %s3719_s15, 1  ;;  %v2789_v5 = vld [vmem:[%s4771_s1 + $0x5] sm:$0x1]  ;;  %vm449_vm2 = vcmask 15360   ;;  %v712_v25 = vsel %vm498_vm0, %v269_v4, 0 }
  0x19   : > { %3582 = vmatprep.subr.msk.bf16.mxu1 %vm498_vm0, %v269_v4  ;;  %3587 = vmatprep.subr.msk.bf16.mxu0 %vm498_vm0, %v2789_v5  ;;  %v3909_v39 = vld [vmem:[%s4771_s1 + $0x2] sm:$0x1]  ;;  %v1678_v41 = vsel %vm498_vm0, %v2789_v5, 0  ;;  %v3938_v57 = vld [vmem:[%s4771_s1 + $0x6] sm:$0x1]  ;;  %vm875_vm3 = vcmask 1045504  }
  0x1a   : > { %s3591_s8 = smul.u32 432, %s189_s5  ;;  %s185_s5 = sand.u32 1, %s3711_s13  }
  0x1b   : > { %s2863_s10 = sshll.u32 %s3719_s15, 12  ;;  %s4724_s15 = scalar_lea.sflag [#allocation3], %s185_s5 }
  0x1c   : > { %s3837_s11 = scalar_lea.vmem %s4770_s0, %s3591_s8  ;;  %s2703_s8 = sshll.u32 %s185_s5, 8 }
  0x1d   : > { %v3840_v6 = vld [vmem:[%s3837_s11] sm:$0xff]  ;;  %v3843_v7 = vld [vmem:[%s3837_s11 + $0x8] sm:$0xff]  ;;  %v3846_v8 = vld [vmem:[%s3837_s11 + $0x10] sm:$0x3]  ;;  %s4647_s9 = scalar_lea.vmem [#allocation2], %s2703_s8  ;;  %s4715_s21 = scalar_lea.hbm %s4773_s3, %s2863_s10 }
  0x1e   : > { %v319_v9 = vrot.slane %v3840_v6, 1  ;;  %v320_v10 = vrot.slane %v3843_v7, 1  ;;  %v322_v11 = vrot.slane %v3846_v8, 1  ;;  %v3852_v12 = vld [vmem:[%s3837_s11 + $0x18] sm:$0xff]  ;;  %v3855_v13 = vld [vmem:[%s3837_s11 + $0x20] sm:$0xff]  ;;  %v3866_v17 = vld [vmem:[%s3837_s11 + $0x30] sm:$0xff] }
  0x1f   : > { %v3858_v14 = vld [vmem:[%s3837_s11 + $0x28] sm:$0x3]  ;;  %v3862_v15 = vpack.c.bf16 %v3855_v13, %v3852_v12  ;;  %v324_v16 = vrot.slane %v3852_v12, 1  ;;  %v325_v20 = vrot.slane %v3855_v13, 1  ;;  %v3873_v22 = vld [vmem:[%s3837_s11 + $0x38] sm:$0xff]  ;;  %v3883_v27 = vld [vmem:[%s3837_s11 + $0x50] sm:$0xff] }
  0x20   : > { %v321_v18 = vsel %vm318_vm1, %v319_v9, %v320_v10  ;;  %v323_v19 = vsel %vm318_vm1, %v320_v10, %v322_v11  ;;  %v327_v21 = vrot.slane %v3858_v14, 1  ;;  %v3876_v23 = vld [vmem:[%s3837_s11 + $0x40] sm:$0x3]  ;;  %v3880_v26 = vld [vmem:[%s3837_s11 + $0x48] sm:$0xff]  ;;  %v329_v30 = vrot.slane %v3866_v17, 1  ;;  %v3904_v38 = vld [vmem:[%s3837_s11 + $0x78] sm:$0xff] }
  0x21   : > { %v431_v24 = vpack.c.bf16 %v323_v19, %v321_v18  ;;  %v326_v28 = vsel %vm318_vm1, %v324_v16, %v325_v20  ;;  %v330_v31 = vrot.slane %v3873_v22, 1  ;;  %v3890_v32 = vld [vmem:[%s3837_s11 + $0x58] sm:$0x3]  ;;  %v3893_v33 = vld [vmem:[%s3837_s11 + $0x60] sm:$0xff]  ;;  %v3896_v34 = vld [vmem:[%s3837_s11 + $0x68] sm:$0xff]  ;;  %v332_v36 = vrot.slane %v3876_v23, 1 }
  0x22   : > { %v328_v29 = vsel %vm318_vm1, %v325_v20, %v327_v21  ;;  %v3901_v37 = vld [vmem:[%s3837_s11 + $0x70] sm:$0x3]  ;;  %v334_v42 = vrot.slane %v3880_v26, 1  ;;  %v335_v43 = vrot.slane %v3883_v27, 1  ;;  %v3916_v44 = vld [vmem:[%s3837_s11 + $0x80] sm:$0xff]  ;;  %v337_v47 = vrot.slane %v3890_v32, 1 }
  0x23   : > { %3019 = vmatprep.mubr.msk.bf16.mxu1 %vm449_vm2, %v431_v24  ;;  %v432_v35 = vpack.c.bf16 %v328_v29, %v326_v28  ;;  %v331_v40 = vsel %vm318_vm1, %v329_v30, %v330_v31  ;;  %v3919_v45 = vld [vmem:[%s3837_s11 + $0x88] sm:$0x3]  ;;  %v333_v46 = vsel %vm318_vm1, %v330_v31, %v332_v36  ;;  %v339_v48 = vrot.slane %v3893_v33, 1  ;;  %v3955_v63 = vld [vmem:[%s3837_s11 + $0x90] sm:$0xff]  ;;  %v3958_v0 = vld [vmem:[%s3837_s11 + $0x98] sm:$0xff]  ;;  %s3729_s26 = smov [#allocation2]  }
  0x24   : > { %v340_v49 = vrot.slane %v3896_v34, 1  ;;  %v3927_v50 = vpack.c.bf16 %v333_v46, %v331_v40  ;;  %v336_v51 = vsel %vm318_vm1, %v334_v42, %v335_v43  ;;  %v342_v52 = vrot.slane %v3901_v37, 1  ;;  %v3961_v2 = vld [vmem:[%s3837_s11 + $0xa0] sm:$0x3]  ;;  %v3966_v4 = vld [vmem:[%s3837_s11 + $0xa8] sm:$0xff]  ;;  %v3969_v5 = vld [vmem:[%s3837_s11 + $0xb0] sm:$0xff] }
  0x25   : > { %3155 = vmatprep.mubr.msk.bf16.mxu0 %vm449_vm2, %v432_v35  ;;  %3020 = vmatmul.mubr.msk.bf16.vlgmr.msra.gmra.mrb[0].mxu1 %vm449_vm2, %v432_v35  ;;  %v344_v53 = vrot.slane %v3904_v38, 1  ;;  %v338_v54 = vsel %vm318_vm1, %v335_v43, %v337_v47  ;;  %v345_v55 = vrot.slane %v3916_v44, 1  ;;  %v347_v56 = vrot.slane %v3919_v45, 1  ;;  %v3972_v9 = vld [vmem:[%s3837_s11 + $0xb8] sm:$0x3]  ;;  %v3995_v29 = vld [vmem:[%s3837_s11 + $0xc0] sm:$0xff] }
  0x26   : > { %3052 = vmatpush3.bf16.msra.mxu1 %v712_v25  ;;  %4803 = vst [vmem:[#allocation7_spill] sm:$0xff] %v3927_v50  ;;  %3156 = vmatmul.mubr.msk.bf16.vlgmr.msra.gmra.mrb[0].mxu0 %vm449_vm2, %v3927_v50  ;;  %v3946_v58 = vpack.c.bf16 %v338_v54, %v336_v51  ;;  %v341_v59 = vsel %vm318_vm1, %v339_v48, %v340_v49  ;;  %v349_v16 = vrot.slane %v3955_v63, 1  ;;  %v350_v18 = vrot.slane %v3958_v0, 1  ;;  %v3998_v30 = vld [vmem:[%s3837_s11 + $0xc8] sm:$0xff]  ;;  %v4003_v36 = vld [vmem:[%s3837_s11 + $0xd0] sm:$0x3] }
  0x27   : > { %3583 = vmatprep.subr.msk.bf16.mxu1 %vm498_vm0, %v3909_v39  ;;  %3023 = vmatprep.mubr.msk.bf16.mxu1 %vm449_vm2, %v3927_v50  ;;  %v343_v60 = vsel %vm318_vm1, %v340_v49, %v342_v52  ;;  %v346_v61 = vsel %vm318_vm1, %v344_v53, %v345_v55  ;;  %v348_v62 = vsel %vm318_vm1, %v345_v55, %v347_v56  ;;  %v352_v19 = vrot.slane %v3961_v2, 1  ;;  %v4026_v49 = vld [vmem:[%s3837_s11 + $0xe8] sm:$0x3]  ;;  %v4031_v53 = vld [vmem:[%s3837_s11 + $0xf0] sm:$0xff]  ;;  %v4034_v54 = vld [vmem:[%s3837_s11 + $0xf8] sm:$0xff]  ;;  %s3653_s27 = sshll.u32 %s3729_s26, 4  ;;  %s3654_s27 = int_to_ptr.vmem [resolvable:$false] %s3653_s27 }
  0x28   : > { %4804 = vst [vmem:[#allocation8_spill] sm:$0xff] %v3946_v58  ;;  %3188 = vmatpush3.bf16.msra.mxu0 %v1678_v41  ;;  %3159 = vmatprep.mubr.msk.bf16.mxu0 %vm449_vm2, %v3946_v58  ;;  %v3974_v10 = vpack.c.bf16 %v343_v60, %v341_v59  ;;  %v3978_v11 = vpack.c.bf16 %v348_v62, %v346_v61  ;;  %v354_v20 = vrot.slane %v3966_v4, 1  ;;  %v355_v21 = vrot.slane %v3969_v5, 1  ;;  %v4043_v61 = vld [vmem:[%s3837_s11 + $0x100] sm:$0x3]  ;;  %s3655_s28 = scalar_lea.vmem %s3654_s27, 8192 }
  0x29   : > { %3588 = vmatprep.subr.msk.bf16.mxu0 %vm498_vm0, %v3938_v57  ;;  %v357_v24 = vrot.slane %v3972_v9, 1  ;;  %v351_v25 = vsel %vm318_vm1, %v349_v16, %v350_v18  ;;  %v353_v28 = vsel %vm318_vm1, %v350_v18, %v352_v19  ;;  %v881_v40 = vrot.slane %v3852_v12, 2 }
  0x2a   : > { %4805 = vst [vmem:[#allocation9_spill] sm:$0xff] %v3974_v10  ;;  %4806 = vst [vmem:[#allocation10_spill] sm:$0xff] %v3978_v11  ;;  %v356_v31 = vsel %vm318_vm1, %v354_v20, %v355_v21  ;;  %v882_v41 = vrot.slane %v3855_v13, 2  ;;  %v884_v42 = vrot.slane %v3858_v14, 2  ;;  %v4008_v43 = vpack.c.bf16 %v353_v28, %v351_v25  ;;  %v4020_v13 = vld [vmem:[%s3837_s11 + $0xd8] sm:$0xff]  ;;  %v4023_v14 = vld [vmem:[%s3837_s11 + $0xe0] sm:$0xff] }
  0x2b   : > { %v358_v35 = vsel %vm318_vm1, %v355_v21, %v357_v24  ;;  %v359_v46 = vrot.slane %v3995_v29, 1  ;;  %v360_v47 = vrot.slane %v3998_v30, 1  ;;  %v362_v12 = vrot.slane %v4003_v36, 1  ;;  %v4059_v28 = vld [vmem:[%s3837_s11 + $0x108] sm:$0xff] }
  0x2c   : > { %4807 = vst [vmem:[#allocation11_spill] sm:$0xff] %v4008_v43  ;;  %v4014_v48 = vpack.c.bf16 %v358_v35, %v356_v31  ;;  %v886_v51 = vrot.slane %v3866_v17, 2  ;;  %v887_v52 = vrot.slane %v3873_v22, 2  ;;  %v889_v55 = vrot.slane %v3876_v23, 2  ;;  %v4062_v31 = vld [vmem:[%s3837_s11 + $0x110] sm:$0xff] }
  0x2d   : > { %3024 = vmatmul.mubr.msk.bf16.gmra.mrb[4].mxu1 %vm449_vm2, %v3946_v58  ;;  %v361_v56 = vsel %vm318_vm1, %v359_v46, %v360_v47  ;;  %v883_v59 = vsel %vm875_vm3, %v881_v40, %v882_v41  ;;  %v885_v60 = vsel %vm875_vm3, %v882_v41, %v884_v42  ;;  %v363_v62 = vsel %vm318_vm1, %v360_v47, %v362_v12  ;;  %v4065_v35 = vld [vmem:[%s3837_s11 + $0x118] sm:$0x3]  ;;  %v4074_v47 = vld [vmem:[%s3837_s11 + $0x120] sm:$0xff] }
  0x2e   : > { %3027 = vmatprep.mubr.msk.bf16.mxu1 %vm449_vm2, %v3974_v10  ;;  %3160 = vmatmul.mubr.msk.bf16.gmra.mrb[4].mxu0 %vm449_vm2, %v3974_v10  ;;  %4808 = vst [vmem:[#allocation12_spill] sm:$0xff] %v4014_v48  ;;  %v364_v23 = vrot.slane %v4020_v13, 1  ;;  %v365_v16 = vrot.slane %v4023_v14, 1  ;;  %v367_v18 = vrot.slane %v4026_v49, 1  ;;  %v369_v19 = vrot.slane %v4031_v53, 1  ;;  %v4114_v10 = vld [vmem:[%s3837_s11 + $0x138] sm:$0xff] }
  0x2f   : > { %3163 = vmatprep.mubr.msk.bf16.mxu0 %vm449_vm2, %v3978_v11  ;;  %v370_v20 = vrot.slane %v4034_v54, 1  ;;  %v372_v21 = vrot.slane %v4043_v61, 1  ;;  %v4054_v24 = vpack.c.bf16 %v363_v62, %v361_v56  ;;  %v4056_v25 = vpack.c.bf16 %v885_v60, %v883_v59  ;;  %v4083_v62 = vld [vmem:[%s3837_s11 + $0x128] sm:$0xff] }
  0x30   : > { %v366_v40 = vsel %vm318_vm1, %v364_v23, %v365_v16  ;;  %v368_v41 = vsel %vm318_vm1, %v365_v16, %v367_v18  ;;  %v888_v42 = vsel %vm875_vm3, %v886_v51, %v887_v52  ;;  %v890_v46 = vsel %vm875_vm3, %v887_v52, %v889_v55  ;;  %v4086_v23 = vld [vmem:[%s3837_s11 + $0x130] sm:$0x3] }
  0x31   : > { %4809 = vst [vmem:[#allocation13_spill] sm:$0xff] %v4054_v24  ;;  %v371_v12 = vsel %vm318_vm1, %v369_v19, %v370_v20  ;;  %v891_v56 = vrot.slane %v3880_v26, 2  ;;  %v892_v59 = vrot.slane %v3883_v27, 2  ;;  %v894_v60 = vrot.slane %v3890_v32, 2 }
  0x32   : > { %v373_v51 = vsel %vm318_vm1, %v370_v20, %v372_v21  ;;  %v374_v52 = vrot.slane %v4059_v28, 1  ;;  %v375_v55 = vrot.slane %v4062_v31, 1  ;;  %v377_v16 = vrot.slane %v4065_v35, 1 }
  0x33   : > { %v1880_v32 = vsel %vm498_vm0, %v3938_v57, 0  ;;  %v4098_v18 = vpack.c.bf16 %v368_v41, %v366_v40  ;;  %v379_v19 = vrot.slane %v4074_v47, 1  ;;  %v380_v20 = vrot.slane %v4083_v62, 1 }
  0x34   : > { %v382_v21 = vrot.slane %v4086_v23, 1  ;;  %v4103_v3 = vpack.c.bf16 %v890_v46, %v888_v42  ;;  %v895_v57 = vsel %vm875_vm3, %v892_v59, %v894_v60  ;;  %v378_v40 = vsel %vm318_vm1, %v375_v55, %v377_v16  ;;  %v4117_v42 = vld [vmem:[%s3837_s11 + $0x140] sm:$0xff] }
  0x35   : > { %3028 = vmatmul.mubr.msk.bf16.gmra.mrb[8].mxu1 %vm449_vm2, %v3978_v11  ;;  %4810 = vst [vmem:[#allocation14_spill] sm:$0xff] %v4098_v18  ;;  %v896_v41 = vrot.slane %v3893_v33, 2  ;;  %v897_v11 = vrot.slane %v3896_v34, 2  ;;  %v899_v46 = vrot.slane %v3901_v37, 2  ;;  %v4127_v60 = vpack.c.bf16 %v3873_v22, %v3866_v17  ;;  %v4141_v17 = vld [vmem:[%s3837_s11 + $0x150] sm:$0xff]  ;;  %v4144_v22 = vld [vmem:[%s3837_s11 + $0x158] sm:$0xff] }
  0x36   : > { %3031 = vmatprep.mubr.msk.bf16.mxu1 %vm449_vm2, %v4008_v43  ;;  %3164 = vmatmul.mubr.msk.bf16.gmra.mrb[8].mxu0 %vm449_vm2, %v4008_v43  ;;  %4811 = vst [vmem:[#allocation15_spill] sm:$0xff] %v4103_v3  ;;  %v376_v43 = vsel %vm318_vm1, %v374_v52, %v375_v55  ;;  %v381_v52 = vsel %vm318_vm1, %v379_v19, %v380_v20  ;;  %v904_v37 = vrot.slane %v3919_v45, 2  ;;  %v384_v16 = vrot.slane %v4114_v10, 1 }
  0x37   : > { %3167 = vmatprep.mubr.msk.bf16.mxu0 %vm449_vm2, %v4014_v48  ;;  %v383_v55 = vsel %vm318_vm1, %v380_v20, %v382_v21  ;;  %v385_v58 = vrot.slane %v4117_v42, 1  ;;  %v898_v19 = vsel %vm875_vm3, %v896_v41, %v897_v11  ;;  %v4155_v45 = vpack.c.bf16 %v3883_v27, %v3880_v26  ;;  %v4160_v21 = vld [vmem:[%s4771_s1 + $0x7] sm:$0x1] }
  0x38   : > { %v4170_v41 = vpack.c.bf16 %v3896_v34, %v3893_v33  ;;  %v389_v27 = vrot.slane %v4141_v17, 1  ;;  %v907_v33 = vrot.slane %v3958_v0, 2  ;;  %v4183_v34 = vpack.c.bf16 %v3916_v44, %v3904_v38 }
  0x3d   : > { %3032 = vmatmul.mubr.msk.bf16.gmra.mrb[12].mxu1 %vm449_vm2, %v4014_v48  ;;  %v4105_v48 = vpack.c.bf16 %v373_v51, %v371_v12  ;;  %v901_v12 = vrot.slane %v3904_v38, 2  ;;  %v4197_v38 = vld [vmem:[%s3837_s11 + $0x168] sm:$0xff] }
  0x3e   : > { %3035 = vmatprep.mubr.msk.bf16.mxu1 %vm449_vm2, %v4054_v24  ;;  %3168 = vmatmul.mubr.msk.bf16.gmra.mrb[12].mxu0 %vm449_vm2, %v4054_v24  ;;  %v893_v24 = vsel %vm875_vm3, %v891_v56, %v892_v59  ;;  %v902_v56 = vrot.slane %v3916_v44, 2  ;;  %v4123_v59 = vld [vmem:[%s3837_s11 + $0x148] sm:$0x3]  ;;  %v4201_v44 = vpack.c.bf16 %v3958_v0, %v3955_v63  ;;  %v879_v0 = vrot.slane %v3846_v8, 2 }
  0x3f   : > { %3189 = vmatprep.mubr.msk.bf16.mxu0 %vm449_vm2, %v4056_v25  ;;  %4812 = vst [vmem:[#allocation16_spill] sm:$0xff] %v4105_v48  ;;  %v4131_v51 = vpack.c.bf16 %v895_v57, %v893_v24  ;;  %v4149_v24 = vpack.c.bf16 %v378_v40, %v376_v43  ;;  %v387_v20 = vrot.slane %v4123_v59, 1  ;;  %v900_v57 = vsel %vm875_vm3, %v897_v11, %v899_v46 }
  0x40   : > { %v4165_v43 = vpack.c.bf16 %v383_v55, %v381_v52  ;;  %v903_v40 = vsel %vm875_vm3, %v901_v12, %v902_v56  ;;  %v905_v26 = vsel %vm875_vm3, %v902_v56, %v904_v37  ;;  %v386_v46 = vsel %vm318_vm1, %v384_v16, %v385_v58 }
  0x41   : > { %4813 = vst [vmem:[#allocation17_spill] sm:$0xff] %v4131_v51  ;;  %4814 = vst [vmem:[#allocation18_spill] sm:$0xff] %v4149_v24  ;;  %v906_v12 = vrot.slane %v3955_v63, 2  ;;  %v909_v56 = vrot.slane %v3961_v2, 2  ;;  %v911_v52 = vrot.slane %v3966_v4, 2  ;;  %v912_v55 = vrot.slane %v3969_v5, 2 }
  0x42   : > { %4815 = vst [vmem:[#allocation19_spill] sm:$0xff] %v4165_v43  ;;  %v876_v37 = vrot.slane %v3840_v6, 2  ;;  %v4192_v16 = vpack.c.bf16 %v900_v57, %v898_v19  ;;  %v4194_v50 = vpack.c.bf16 %v905_v26, %v903_v40  ;;  %v4212_v19 = vld [vmem:[%s3837_s11 + $0x178] sm:$0x3]  ;;  %v4216_v57 = vpack.c.bf16 %v3969_v5, %v3966_v4 }
  0x43   : > { %v877_v63 = vrot.slane %v3843_v7, 2  ;;  %v913_v26 = vsel %vm875_vm3, %v911_v52, %v912_v55  ;;  %v4230_v4 = vpack.c.bf16 %v3998_v30, %v3995_v29  ;;  %v4259_v52 = vpack.c.bf16 %v4117_v42, %v4114_v10 }
  0x44   : > { %4816 = vst [vmem:[#allocation20_spill] sm:$0xff] %v4192_v16  ;;  %4817 = vst [vmem:[#allocation21_spill] sm:$0xff] %v4194_v50 }
  0x45   : > { %3036 = vmatmul.mubr.msk.bf16.gmra.mrb[16].mxu1 %vm449_vm2, %v4098_v18  ;;  %v4147_v18 = vld [vmem:[%s3837_s11 + $0x160] sm:$0x3] }
  0x46   : > { %3039 = vmatprep.mubr.msk.bf16.mxu1 %vm449_vm2, %v4105_v48  ;;  %3190 = vmatmul.mubr.msk.bf16.vlgmr.msra.gmra.mrb[0].mxu0 %vm449_vm2, %v4103_v3  ;;  %v390_v48 = vrot.slane %v4144_v22, 1  ;;  %v392_v11 = vrot.slane %v4147_v18, 1  ;;  %v919_v3 = vrot.slane %v4003_v36, 2 }
  0x47   : > { %3222 = vmatpush3.bf16.msra.mxu0 %v1880_v32  ;;  %3193 = vmatprep.mubr.msk.bf16.mxu0 %vm449_vm2, %v4131_v51  ;;  %v388_v32 = vsel %vm318_vm1, %v385_v58, %v387_v20  ;;  %v914_v20 = vrot.slane %v3972_v9, 2  ;;  %v4209_v51 = vld [vmem:[%s3837_s11 + $0x170] sm:$0xff]  ;;  %v910_v9 = vsel %vm875_vm3, %v907_v33, %v909_v56  ;;  %v4255_v56 = vpack.c.bf16 %v4083_v62, %v4074_v47 }
  0x48   : > { %3589 = vmatprep.subr.msk.bf16.mxu0 %vm498_vm0, %v4160_v21  ;;  %v391_v58 = vsel %vm318_vm1, %v389_v27, %v390_v48  ;;  %v393_v2 = vsel %vm318_vm1, %v390_v48, %v392_v11  ;;  %v4222_v40 = vpack.c.bf16 %v388_v32, %v386_v46  ;;  %v908_v48 = vsel %vm875_vm3, %v906_v12, %v907_v33 }
  0x49   : > { %v394_v27 = vrot.slane %v4197_v38, 1  ;;  %v4234_v8 = vpack.c.bf16 %v393_v2, %v391_v58  ;;  %v395_v5 = vrot.slane %v4209_v51, 1  ;;  %v397_v11 = vrot.slane %v4212_v19, 1 }
  0x4a   : > { %v4240_v46 = vpack.c.bf16 %v4023_v14, %v4020_v13  ;;  %v915_v12 = vsel %vm875_vm3, %v912_v55, %v914_v20  ;;  %v4247_v33 = vpack.c.bf16 %v4034_v54, %v4031_v53  ;;  %v4251_v32 = vpack.c.bf16 %v4062_v31, %v4059_v28 }
  0x4b   : > { %v4263_v58 = vpack.c.bf16 %v4144_v22, %v4141_v17  ;;  %v4267_v55 = vpack.c.bf16 %v4209_v51, %v4197_v38  ;;  %v4270_v2 = vsel %vm875_vm3, %v876_v37, %v877_v63  ;;  %v4273_v20 = vsel %vm875_vm3, %v877_v63, %v879_v0 }
  0x4c   : > { %v396_v1 = vsel %vm318_vm1, %v394_v27, %v395_v5  ;;  %v917_v37 = vrot.slane %v3998_v30, 2  ;;  %v398_v63 = vsel %vm318_vm1, %v395_v5, %v397_v11  ;;  %v922_v0 = vrot.slane %v4023_v14, 2 }
  0x4d   : > { %3040 = vmatmul.mubr.msk.bf16.gmra.mrb[20].mxu1 %vm449_vm2, %v4149_v24  ;;  %v916_v24 = vrot.slane %v3995_v29, 2  ;;  %v921_v29 = vrot.slane %v4020_v13, 2  ;;  %v4297_v30 = vpack.c.bf16 %v398_v63, %v396_v1  ;;  %v926_v1 = vrot.slane %v4031_v53, 2 }
  0x4e   : > { %3043 = vmatprep.mubr.msk.bf16.mxu1 %vm449_vm2, %v4165_v43  ;;  %3194 = vmatmul.mubr.msk.bf16.gmra.mrb[4].mxu0 %vm449_vm2, %v4192_v16  ;;  %v4275_v43 = vpack.c.bf16 %v910_v9, %v908_v48  ;;  %v4282_v16 = vpack.c.bf16 %v915_v12, %v913_v26  ;;  %v924_v48 = vrot.slane %v4026_v49, 2  ;;  %v920_v9 = vsel %vm875_vm3, %v917_v37, %v919_v3 }
  0x4f   : > { %3197 = vmatprep.mubr.msk.bf16.mxu0 %vm449_vm2, %v4194_v50  ;;  %v988_v50 = vpack.c.bf16 %v4273_v20, %v4270_v2  ;;  %v918_v36 = vsel %vm875_vm3, %v916_v24, %v917_v37  ;;  %v253_v26 = vpack.c.bf16 %v3843_v7, %v3840_v6  ;;  %v923_v13 = vsel %vm875_vm3, %v921_v29, %v922_v0  ;;  %v4819_v2 = vld [vmem:[#allocation5_spill] sm:$0xff]  ;;  %v4821_v20 = vld [vmem:[#allocation20_spill] sm:$0xff] }
  0x50   : > { %v925_v14 = vsel %vm875_vm3, %v922_v0, %v924_v48  ;;  %v4305_v49 = vpack.c.bf16 %v920_v9, %v918_v36  ;;  %v927_v24 = vrot.slane %v4034_v54, 2  ;;  %v929_v3 = vrot.slane %v4043_v61, 2 }
  0x51   : > { %v4309_v27 = vpack.c.bf16 %v925_v14, %v923_v13  ;;  %v931_v6 = vrot.slane %v4059_v28, 2  ;;  %v932_v7 = vrot.slane %v4062_v31, 2  ;;  %v934_v5 = vrot.slane %v4065_v35, 2  ;;  %v4333_v35 = vld [vmem:[%s4771_s1 + $0x3] sm:$0x1] }
  0x52   : > { %v928_v53 = vsel %vm875_vm3, %v926_v1, %v927_v24  ;;  %v930_v54 = vsel %vm875_vm3, %v927_v24, %v929_v3  ;;  %v1055_v28 = vsel %vm498_vm0, %v3909_v39, 0  ;;  %v936_v37 = vrot.slane %v4074_v47, 2  ;;  %v247_v3 = vld [vmem:[%s3837_s11 + $0x180] sm:$0xff] }
  0x53   : > { %v933_v61 = vsel %vm875_vm3, %v931_v6, %v932_v7  ;;  %v935_v11 = vsel %vm875_vm3, %v932_v7, %v934_v5  ;;  %v4328_v31 = vpack.c.bf16 %v930_v54, %v928_v53  ;;  %v937_v63 = vrot.slane %v4083_v62, 2  ;;  %v249_v6 = vld [vmem:[%s3837_s11 + $0x190] sm:$0x3] }
  0x54   : > { %v4337_v12 = vpack.c.bf16 %v935_v11, %v933_v61  ;;  %v939_v29 = vrot.slane %v4086_v23, 2  ;;  %v941_v39 = vrot.slane %v4114_v10, 2  ;;  %v942_v0 = vrot.slane %v4117_v42, 2 }
  0x55   : > { %3044 = vmatmul.mubr.msk.bf16.gmra.mrb[24].mxu1 %vm449_vm2, %v4222_v40  ;;  %v944_v48 = vrot.slane %v4123_v59, 2  ;;  %v938_v47 = vsel %vm875_vm3, %v936_v37, %v937_v63  ;;  %v946_v36 = vrot.slane %v4141_v17, 2  ;;  %v947_v9 = vrot.slane %v4144_v22, 2 }
  0x56   : > { %3047 = vmatprep.mubr.msk.bf16.mxu1 %vm449_vm2, %v4234_v8  ;;  %3198 = vmatmul.mubr.msk.bf16.gmra.mrb[8].mxu0 %vm449_vm2, %v4275_v43  ;;  %v940_v62 = vsel %vm875_vm3, %v937_v63, %v939_v29  ;;  %v943_v23 = vsel %vm875_vm3, %v941_v39, %v942_v0  ;;  %v951_v13 = vrot.slane %v4197_v38, 2  ;;  %v952_v14 = vrot.slane %v4209_v51, 2  ;;  %v248_v38 = vld [vmem:[%s3837_s11 + $0x188] sm:$0xff] }
  0x57   : > { %3201 = vmatprep.mubr.msk.bf16.mxu0 %vm449_vm2, %v4282_v16  ;;  %v945_v10 = vsel %vm875_vm3, %v942_v0, %v944_v48  ;;  %v4357_v42 = vpack.c.bf16 %v940_v62, %v938_v47  ;;  %v954_v1 = vrot.slane %v4212_v19, 2  ;;  %v948_v17 = vsel %vm875_vm3, %v946_v36, %v947_v9  ;;  %v2840_v47 = vld [vmem:[%s4771_s1 + $0x8] sm:$0x1]  ;;  %v4818_v62 = vld [vmem:[#allocation15_spill] sm:$0xff] }
  0x58   : > { %v4361_v59 = vpack.c.bf16 %v945_v10, %v943_v23  ;;  %v1664_v7 = vrot.slane %v247_v3, 2  ;;  %v1665_v5 = vrot.slane %v248_v38, 2  ;;  %v1667_v53 = vrot.slane %v249_v6, 2  ;;  %v250_v23 = vld [vmem:[%s3837_s11 + $0x198] sm:$0xff]  ;;  %v251_v10 = vld [vmem:[%s3837_s11 + $0x1a0] sm:$0xff] }
  0x59   : > { %v955_v24 = vsel %vm875_vm3, %v952_v14, %v954_v1  ;;  %v1455_v54 = vrot.slane %v247_v3, 1  ;;  %v1456_v61 = vrot.slane %v248_v38, 1  ;;  %v1458_v11 = vrot.slane %v249_v6, 1  ;;  %v4826_v6 = vld [vmem:[#allocation10_spill] sm:$0xff] }
  0x5a   : > { %v1668_v37 = vsel %vm875_vm3, %v1665_v5, %v1667_v53  ;;  %v2092_v48 = vsel %vm498_vm0, %v4160_v21, 0  ;;  %v1257_v21 = vsel %vm498_vm0, %v4333_v35, 0  ;;  %v2287_v36 = vrot.slane %v250_v23, 2  ;;  %v4829_v53 = vld [vmem:[#allocation13_spill] sm:$0xff] }
  0x5b   : > { %v1457_v63 = vsel %vm318_vm1, %v1455_v54, %v1456_v61  ;;  %v1459_v29 = vsel %vm318_vm1, %v1456_v61, %v1458_v11  ;;  %v4830_v54 = vld [vmem:[#allocation14_spill] sm:$0xff]  ;;  %v4831_v61 = vld [vmem:[#allocation16_spill] sm:$0xff] }
  0x5c   : > { %v4398_v39 = vpack.c.bf16 %v1459_v29, %v1457_v63  ;;  %v4832_v11 = vld [vmem:[#allocation6_spill] sm:$0xff] }
  0x5d   : > { %3048 = vmatmul.mubr.msk.bf16.gmra.mrb[28].mxu1 %vm449_vm2, %v4297_v30 }
  0x5e   : > { %3053 = vmatprep.mubr.msk.bf16.mxu1 %vm449_vm2, %v253_v26  ;;  %3202 = vmatmul.mubr.msk.bf16.gmra.mrb[12].mxu0 %vm449_vm2, %v4305_v49  ;;  %v949_v26 = vrot.slane %v4147_v18, 2  ;;  %v953_v18 = vsel %vm875_vm3, %v951_v13, %v952_v14  ;;  %v1873_v14 = vpack.c.bf16 %v251_v10, %v250_v23 }
  0x5f   : > { %3205 = vmatprep.mubr.msk.bf16.mxu0 %vm449_vm2, %v4309_v27  ;;  %v4386_v19 = vpack.c.bf16 %v955_v24, %v953_v18  ;;  %v4823_v18 = vld [vmem:[#allocation7_spill] sm:$0xff]  ;;  %v2301_v24 = vsel %vm498_vm0, %v2840_v47, 0 }
  0x60   : > { %v950_v22 = vsel %vm875_vm3, %v947_v9, %v949_v26  ;;  %v2288_v9 = vrot.slane %v251_v10, 2  ;;  %v252_v26 = vld [vmem:[%s3837_s11 + $0x1a8] sm:$0x3]  ;;  %s2616_s11 = sshll.u32 %s4647_s9, 4  ;;  %s4717_s11 = int_to_ptr.vmem [resolvable:$true] %s2616_s11 }
  0x61   : > { %v4382_v51 = vpack.c.bf16 %v950_v22, %v948_v17  ;;  %v2290_v13 = vrot.slane %v252_v26, 2  ;;  %s3649_s23 = scalar_lea.vmem %s4717_s11, 4096  ;;  %p3656_p1 = scmp.lt.s32.totalorder %s4717_s11, %s3654_s27 }
  0x62   : > { %v4486_v1 = vsel %vm875_vm3, %v2287_v36, %v2288_v9  ;;  %p3650_p12 = scmp.ne.s32.totalorder %s4717_s11, %s3649_s23  ;;  %p3657_p2 = scmp.lt.s32.totalorder %s3655_s28, %s3649_s23 }
  0x63   : > { %v4489_v17 = vsel %vm875_vm3, %v2288_v9, %v2290_v13 }
  0x64   : > { %v2294_v22 = vpack.c.bf16 %v4489_v17, %v4486_v1  ;;  %p3651_p13 = pnand %p3650_p12, %p3792_p4  ;;  %p3658_p3 = por %p3657_p2, %p3656_p1 }
  0x65   : > { %3054 = vmatmul.mubr.msk.bf16.vlgmr.msra.gmra.mrb[0].mxu1 %vm449_vm2, %v3862_v15 }
  0x66   : > { %3086 = vmatpush3.bf16.msra.mxu1 %v1055_v28  ;;  %3057 = vmatprep.mubr.msk.bf16.mxu1 %vm449_vm2, %v4127_v60  ;;  %v1666_v28 = vsel %vm875_vm3, %v1664_v7, %v1665_v5  ;;  %v4827_v7 = vld [vmem:[#allocation11_spill] sm:$0xff]  ;;  %v4828_v5 = vld [vmem:[#allocation12_spill] sm:$0xff]  ;;  %p3652_p0 = pneg %p3651_p13 }
  0x67   : > { %3584 = vmatprep.subr.msk.bf16.mxu1 %vm498_vm0, %v4333_v35  ;;  %3206 = vmatmul.mubr.msk.bf16.gmra.mrb[16].mxu0 %vm449_vm2, %v4328_v31  ;;  %v4400_v0 = vpack.c.bf16 %v1668_v37, %v1666_v28  ;;  %v4472_v35 = vpack.c.bf16 %v248_v38, %v247_v3  ;;  %v4824_v3 = vld [vmem:[#allocation8_spill] sm:$0xff]  ;;  %v4825_v38 = vld [vmem:[#allocation9_spill] sm:$0xff]  ;;  %v4833_v28 = vld [vmem:[#allocation18_spill] sm:$0xff] }
  0x68   : > { %3209 = vmatprep.mubr.msk.bf16.mxu0 %vm449_vm2, %v4337_v12  ;;  %v4834_v37 = vld [vmem:[#allocation19_spill] sm:$0xff]  ;;  %p3659_p5 = pnand %p3658_p3, %p3652_p0 }
  0x6d   : > { %3058 = vmatmul.mubr.msk.bf16.gmra.mrb[4].mxu1 %vm449_vm2, %v4155_v45 }
  0x6e   : > { %3061 = vmatprep.mubr.msk.bf16.mxu1 %vm449_vm2, %v4170_v41 }
  0x6f   : > { %3210 = vmatmul.mubr.msk.bf16.gmra.mrb[20].mxu0 %vm449_vm2, %v4357_v42 }
  0x70   : > { %3213 = vmatprep.mubr.msk.bf16.mxu0 %vm449_vm2, %v4361_v59 }
  0x75   : > { %3062 = vmatmul.mubr.msk.bf16.gmra.mrb[8].mxu1 %vm449_vm2, %v4183_v34 }
  0x76   : > { %3065 = vmatprep.mubr.msk.bf16.mxu1 %vm449_vm2, %v4201_v44 }
  0x77   : > { %3214 = vmatmul.mubr.msk.bf16.gmra.mrb[24].mxu0 %vm449_vm2, %v4382_v51 }
  0x78   : > { %3217 = vmatprep.mubr.msk.bf16.mxu0 %vm449_vm2, %v4386_v19 }
  0x7d   : > { %3066 = vmatmul.mubr.msk.bf16.gmra.mrb[12].mxu1 %vm449_vm2, %v4216_v57 }
  0x7e   : > { %3069 = vmatprep.mubr.msk.bf16.mxu1 %vm449_vm2, %v4230_v4 }
  0x7f   : > { %3218 = vmatmul.mubr.msk.bf16.gmra.mrb[28].mxu0 %vm449_vm2, %v4400_v0 }
  0x80   : > { %3223 = vmatprep.mubr.msk.bf16.mxu0 %vm449_vm2, %v4127_v60 }
  0x85   : > { %3070 = vmatmul.mubr.msk.bf16.gmra.mrb[16].mxu1 %vm449_vm2, %v4240_v46 }
  0x86   : > { %3073 = vmatprep.mubr.msk.bf16.mxu1 %vm449_vm2, %v4247_v33 }
  0x87   : > { %3224 = vmatmul.mubr.msk.bf16.vlgmr.msra.gmra.mrb[0].mxu0 %vm449_vm2, %v4155_v45 }
  0x88   : > { %3256 = vmatpush3.bf16.msra.mxu0 %v2092_v48  ;;  %3227 = vmatprep.mubr.msk.bf16.mxu0 %vm449_vm2, %v4170_v41 }
  0x89   : > { %3590 = vmatprep.subr.msk.bf16.mxu0 %vm498_vm0, %v2840_v47 }
  0x8d   : > { %3074 = vmatmul.mubr.msk.bf16.gmra.mrb[20].mxu1 %vm449_vm2, %v4251_v32 }
  0x8e   : > { %3077 = vmatprep.mubr.msk.bf16.mxu1 %vm449_vm2, %v4255_v56 }
  0x8f   : > { %3228 = vmatmul.mubr.msk.bf16.gmra.mrb[4].mxu0 %vm449_vm2, %v4183_v34 }
  0x90   : > { %3231 = vmatprep.mubr.msk.bf16.mxu0 %vm449_vm2, %v4201_v44 }
  0x95   : > { %3078 = vmatmul.mubr.msk.bf16.gmra.mrb[24].mxu1 %vm449_vm2, %v4259_v52 }
  0x96   : > { %3081 = vmatprep.mubr.msk.bf16.mxu1 %vm449_vm2, %v4263_v58 }
  0x97   : > { %3232 = vmatmul.mubr.msk.bf16.gmra.mrb[8].mxu0 %vm449_vm2, %v4216_v57 }
  0x98   : > { %3235 = vmatprep.mubr.msk.bf16.mxu0 %vm449_vm2, %v4230_v4 }
  0x9d   : > { %3082 = vmatmul.mubr.msk.bf16.gmra.mrb[28].mxu1 %vm449_vm2, %v4267_v55 }
  0x9e   : > { %3087 = vmatprep.mubr.msk.bf16.mxu1 %vm449_vm2, %v988_v50  ;;  %v4820_v50 = vld [vmem:[#allocation17_spill] sm:$0xff] }
  0x9f   : > { %3236 = vmatmul.mubr.msk.bf16.gmra.mrb[12].mxu0 %vm449_vm2, %v4240_v46 }
  0xa0   : > { %3239 = vmatprep.mubr.msk.bf16.mxu0 %vm449_vm2, %v4247_v33 }
  0xa5   : > { %3088 = vmatmul.mubr.msk.bf16.vlgmr.msra.gmra.mrb[0].mxu1 %vm449_vm2, %v4056_v25  ;;  %v4822_v25 = vld [vmem:[#allocation21_spill] sm:$0xff] }
  0xa6   : > { %3120 = vmatpush3.bf16.msra.mxu1 %v1257_v21  ;;  %3091 = vmatprep.mubr.msk.bf16.mxu1 %vm449_vm2, %v4818_v62 }
  0xa7   : > { %3586 = vmatprep.subr.msk.bf16.mxu1 %vm498_vm0, %v4819_v2  ;;  %3240 = vmatmul.mubr.msk.bf16.gmra.mrb[16].mxu0 %vm449_vm2, %v4251_v32 }
  0xa8   : > { %3243 = vmatprep.mubr.msk.bf16.mxu0 %vm449_vm2, %v4255_v56 }
  0xad   : > { %3092 = vmatmul.mubr.msk.bf16.gmra.mrb[4].mxu1 %vm449_vm2, %v4820_v50 }
  0xae   : > { %3095 = vmatprep.mubr.msk.bf16.mxu1 %vm449_vm2, %v4821_v20 }
  0xaf   : > { %3244 = vmatmul.mubr.msk.bf16.gmra.mrb[20].mxu0 %vm449_vm2, %v4259_v52 }
  0xb0   : > { %3247 = vmatprep.mubr.msk.bf16.mxu0 %vm449_vm2, %v4263_v58 }
  0xb5   : > { %3096 = vmatmul.mubr.msk.bf16.gmra.mrb[8].mxu1 %vm449_vm2, %v4822_v25 }
  0xb6   : > { %3099 = vmatprep.mubr.msk.bf16.mxu1 %vm449_vm2, %v4275_v43 }
  0xb7   : > { %3248 = vmatmul.mubr.msk.bf16.gmra.mrb[24].mxu0 %vm449_vm2, %v4267_v55 }
  0xb8   : > { %3251 = vmatprep.mubr.msk.bf16.mxu0 %vm449_vm2, %v4472_v35 }
  0xbd   : > { %3100 = vmatmul.mubr.msk.bf16.gmra.mrb[12].mxu1 %vm449_vm2, %v4282_v16 }
  0xbe   : > { %3103 = vmatprep.mubr.msk.bf16.mxu1 %vm449_vm2, %v4305_v49 }
  0xbf   : > { %3252 = vmatmul.mubr.msk.bf16.gmra.mrb[28].mxu0 %vm449_vm2, %v1873_v14 }
  0xc0   : > { %3257 = vmatprep.mubr.msk.bf16.mxu0 %vm449_vm2, %v4823_v18 }
  0xc5   : > { %3104 = vmatmul.mubr.msk.bf16.gmra.mrb[16].mxu1 %vm449_vm2, %v4309_v27 }
  0xc6   : > { %3107 = vmatprep.mubr.msk.bf16.mxu1 %vm449_vm2, %v4328_v31 }
  0xc7   : > { %3258 = vmatmul.mubr.msk.bf16.vlgmr.msra.gmra.mrb[0].mxu0 %vm449_vm2, %v4824_v3 }
  0xc8   : > { %3290 = vmatpush3.bf16.msra.mxu0 %v2301_v24  ;;  %3261 = vmatprep.mubr.msk.bf16.mxu0 %vm449_vm2, %v4825_v38 }
  0xcd   : > { %3108 = vmatmul.mubr.msk.bf16.gmra.mrb[20].mxu1 %vm449_vm2, %v4337_v12 }
  0xce   : > { %3111 = vmatprep.mubr.msk.bf16.mxu1 %vm449_vm2, %v4357_v42 }
  0xcf   : > { %3262 = vmatmul.mubr.msk.bf16.gmra.mrb[4].mxu0 %vm449_vm2, %v4826_v6 }
  0xd0   : > { %3265 = vmatprep.mubr.msk.bf16.mxu0 %vm449_vm2, %v4827_v7 }
  0xd5   : > { %3112 = vmatmul.mubr.msk.bf16.gmra.mrb[24].mxu1 %vm449_vm2, %v4361_v59 }
  0xd6   : > { %3115 = vmatprep.mubr.msk.bf16.mxu1 %vm449_vm2, %v4382_v51 }
  0xd7   : > { %3266 = vmatmul.mubr.msk.bf16.gmra.mrb[8].mxu0 %vm449_vm2, %v4828_v5 }
  0xd8   : > { %3269 = vmatprep.mubr.msk.bf16.mxu0 %vm449_vm2, %v4829_v53 }
  0xdd   : > { %3116 = vmatmul.mubr.msk.bf16.gmra.mrb[28].mxu1 %vm449_vm2, %v4386_v19 }
  0xde   : > { %3121 = vmatprep.mubr.msk.bf16.mxu1 %vm449_vm2, %v3862_v15  ;;  %v2078_v15 = vrot.slane %v250_v23, 1 }
  0xdf   : > { %3270 = vmatmul.mubr.msk.bf16.gmra.mrb[12].mxu0 %vm449_vm2, %v4830_v54 }
  0xe0   : > { %3273 = vmatprep.mubr.msk.bf16.mxu0 %vm449_vm2, %v4831_v61 }
  0xe5   : > { %3122 = vmatmul.mubr.msk.bf16.vlgmr.msra.gmra.mrb[0].mxu1 %vm449_vm2, %v4127_v60  ;;  %v2079_v60 = vrot.slane %v251_v10, 1 }
  0xe6   : > { %3324 = vmatpush3.bf16.msra.mxu1 %v4832_v11  ;;  %3125 = vmatprep.mubr.msk.bf16.mxu1 %vm449_vm2, %v4155_v45  ;;  %v2081_v45 = vrot.slane %v252_v26, 1 }
  0xe7   : > { %3274 = vmatmul.mubr.msk.bf16.gmra.mrb[16].mxu0 %vm449_vm2, %v4833_v28 }
  0xe8   : > { %3277 = vmatprep.mubr.msk.bf16.mxu0 %vm449_vm2, %v4834_v37 }
  0xed   : > { %3126 = vmatmul.mubr.msk.bf16.gmra.mrb[4].mxu1 %vm449_vm2, %v4170_v41  ;;  %v2080_v41 = vsel %vm318_vm1, %v2078_v15, %v2079_v60 }
  0xee   : > { %3129 = vmatprep.mubr.msk.bf16.mxu1 %vm449_vm2, %v4183_v34  ;;  %v2082_v34 = vsel %vm318_vm1, %v2079_v60, %v2081_v45 }
  0xef   : > { %3278 = vmatmul.mubr.msk.bf16.gmra.mrb[20].mxu0 %vm449_vm2, %v4222_v40  ;;  %v2085_v63 = vpack.c.bf16 %v2082_v34, %v2080_v41 }
  0xf0   : > { %3281 = vmatprep.mubr.msk.bf16.mxu0 %vm449_vm2, %v4234_v8 }
  0xf5   : > { %3130 = vmatmul.mubr.msk.bf16.gmra.mrb[8].mxu1 %vm449_vm2, %v4201_v44 }
  0xf6   : > { %3133 = vmatprep.mubr.msk.bf16.mxu1 %vm449_vm2, %v4216_v57 }
  0xf7   : > { %3282 = vmatmul.mubr.msk.bf16.gmra.mrb[24].mxu0 %vm449_vm2, %v4297_v30 }
  0xf8   : > { %3285 = vmatprep.mubr.msk.bf16.mxu0 %vm449_vm2, %v4398_v39 }
  0xfd   : > { %3134 = vmatmul.mubr.msk.bf16.gmra.mrb[12].mxu1 %vm449_vm2, %v4230_v4 }
  0xfe   : > { %3137 = vmatprep.mubr.msk.bf16.mxu1 %vm449_vm2, %v4240_v46 }
  0xff   : > { %3286 = vmatmul.mubr.msk.bf16.gmra.mrb[28].mxu0 %vm449_vm2, %v2085_v63 }
 0x100   : > { %3291 = vmatprep.mubr.msk.bf16.mxu0 %vm449_vm2, %v4818_v62 }
 0x105   : > { %3138 = vmatmul.mubr.msk.bf16.gmra.mrb[16].mxu1 %vm449_vm2, %v4247_v33 }
 0x106   : > { %3141 = vmatprep.mubr.msk.bf16.mxu1 %vm449_vm2, %v4251_v32 }
 0x107   : > { %3292 = vmatmul.mubr.msk.bf16.vlgmr.msra.gmra.mrb[0].mxu0 %vm449_vm2, %v4820_v50 }
 0x108   : > { %3295 = vmatprep.mubr.msk.bf16.mxu0 %vm449_vm2, %v4821_v20 }
 0x10d   : > { %3142 = vmatmul.mubr.msk.bf16.gmra.mrb[20].mxu1 %vm449_vm2, %v4255_v56 }
 0x10e   : > { %3145 = vmatprep.mubr.msk.bf16.mxu1 %vm449_vm2, %v4259_v52 }
 0x10f   : > { %3296 = vmatmul.mubr.msk.bf16.gmra.mrb[4].mxu0 %vm449_vm2, %v4822_v25 }
 0x110   : > { %3299 = vmatprep.mubr.msk.bf16.mxu0 %vm449_vm2, %v4275_v43 }
 0x115   : > { %3146 = vmatmul.mubr.msk.bf16.gmra.mrb[24].mxu1 %vm449_vm2, %v4263_v58 }
 0x116   : > { %3149 = vmatprep.mubr.msk.bf16.mxu1 %vm449_vm2, %v4267_v55 }
 0x117   : > { %3300 = vmatmul.mubr.msk.bf16.gmra.mrb[8].mxu0 %vm449_vm2, %v4282_v16 }
 0x118   : > { %3303 = vmatprep.mubr.msk.bf16.mxu0 %vm449_vm2, %v4305_v49 }
 0x11d   : > { %3150 = vmatmul.mubr.msk.bf16.gmra.mrb[28].mxu1 %vm449_vm2, %v4472_v35 }
 0x11e   : > { %3171 = vmatprep.mubr.msk.bf16.mxu1 %vm449_vm2, %v4830_v54 }
 0x11f   : > { %3304 = vmatmul.mubr.msk.bf16.gmra.mrb[12].mxu0 %vm449_vm2, %v4309_v27 }
 0x120   : > { %3307 = vmatprep.mubr.msk.bf16.mxu0 %vm449_vm2, %v4328_v31  ;;  %v4639_v31 = vld [vmem:[%s4772_s2] ss:$0 sm:$0xff] }
 0x125   : > { %3172 = vmatmul.mubr.msk.bf16.vlgmr.msra.gmra.mrb[16].mxu1 %vm449_vm2, %v4831_v61 }
 0x126   : > { %3175 = vmatprep.mubr.msk.bf16.mxu1 %vm449_vm2, %v4833_v28 }
 0x127   : > { %3308 = vmatmul.mubr.msk.bf16.gmra.mrb[16].mxu0 %vm449_vm2, %v4337_v12 }
 0x128   : > { %3311 = vmatprep.mubr.msk.bf16.mxu0 %vm449_vm2, %v4357_v42 }
 0x12d   : > { %3176 = vmatmul.mubr.msk.bf16.gmra.mrb[20].mxu1 %vm449_vm2, %v4834_v37 }
 0x12e   : > { %3179 = vmatprep.mubr.msk.bf16.mxu1 %vm449_vm2, %v4222_v40 }
 0x12f   : > { %3312 = vmatmul.mubr.msk.bf16.gmra.mrb[20].mxu0 %vm449_vm2, %v4361_v59 }
 0x130   : > { %3315 = vmatprep.mubr.msk.bf16.mxu0 %vm449_vm2, %v4382_v51 }
 0x135   : > { %3180 = vmatmul.mubr.msk.bf16.gmra.mrb[24].mxu1 %vm449_vm2, %v4234_v8 }
 0x136   : > { %3183 = vmatprep.mubr.msk.bf16.mxu1 %vm449_vm2, %v4297_v30 }
 0x137   : > { %3316 = vmatmul.mubr.msk.bf16.gmra.mrb[24].mxu0 %vm449_vm2, %v4386_v19 }
 0x138   : > { %3319 = vmatprep.mubr.msk.bf16.mxu0 %vm449_vm2, %v4400_v0 }
 0x13d   : > { %3184 = vmatmul.mubr.msk.bf16.gmra.mrb[28].mxu1 %vm449_vm2, %v4398_v39 }
 0x13f   : > { %3320 = vmatmul.mubr.msk.bf16.gmra.mrb[28].mxu0 %vm449_vm2, %v2294_v22 }
 0x1b8   : > { %v3123_v43 = vpop.f32.mrb[0].mxu1 }
 0x1b9   : > { %v1293_v16 = vpop.f32.mrb[1].mxu1 }
 0x1ba   : > { %v3124_v44 = vpop.f32.mrb[2].mxu1 }
 0x1bb   : > { %v1296_v57 = vpop.f32.mrb[3].mxu1 }
 0x1c0   : > { %v3127_v40 = vpop.f32.mrb[4].mxu1 }
 0x1c1   : > { %v1309_v4 = vpop.f32.mrb[5].mxu1 }
 0x1c2   : > { %v3128_v8 = vpop.f32.mrb[6].mxu1 }
 0x1c3   : > { %v1312_v46 = vpop.f32.mrb[7].mxu1 }
 0x1c8   : > { %v3131_v33 = vpop.f32.mrb[8].mxu1 }
 0x1c9   : > { %v1325_v32 = vpop.f32.mrb[9].mxu1 }
 0x1ca   : > { %v3132_v56 = vpop.f32.mrb[10].mxu1 }
 0x1cb   : > { %v1328_v52 = vpop.f32.mrb[11].mxu1 }
 0x1d0   : > { %v4627_v58 = vpop.f32.mrb[12].mxu1 }
 0x1d1   : > { %v4629_v55 = vpop.f32.mrb[13].mxu1 }
 0x1d2   : > { %v4631_v30 = vpop.f32.mrb[14].mxu1 }
 0x1d3   : > { %v4633_v49 = vpop.f32.mrb[15].mxu1 }
 0x1da   : > { %v3293_v27 = vpop.f32.mrb[0].mxu0 }
 0x1db   : > { %v3325_v12 = vadd.f32 %v3293_v27, %v3123_v43  ;;  %v2337_v42 = vpop.f32.mrb[1].mxu0 }
 0x1dc   : > { %v3326_v59 = vadd.f32 %v2337_v42, %v1293_v16  ;;  %v3294_v51 = vpop.f32.mrb[2].mxu0 }
 0x1dd   : > { %v2505_v19 = vadd.f32 %v3325_v12, %v4639_v31  ;;  %v3327_v29 = vadd.f32 %v3294_v51, %v3124_v44  ;;  %v2340_v39 = vpop.f32.mrb[3].mxu0 }
 0x1de   : > { %v2503_v0 = vadd.f32 %v3326_v59, %v4639_v31  ;;  %v3328_v48 = vadd.f32 %v2340_v39, %v1296_v57 }
 0x1df   : > { %v2537_v47 = vmax.f32 %v2505_v19, 0.0  ;;  %v2506_v21 = vadd.f32 %v3327_v29, %v4639_v31 }
 0x1e0   : > { %v2535_v62 = vmax.f32 %v2503_v0, 0.0  ;;  %v2504_v2 = vadd.f32 %v3328_v48, %v4639_v31 }
 0x1e1   : > { %2569 = vst [vmem:[%s4647_s9 + $0x10] sm:$0xff] %v2537_v47  ;;  %v2538_v50 = vmax.f32 %v2506_v21, 0.0 }
 0x1e2   : > { %2567 = vst [vmem:[%s4647_s9] sm:$0xff] %v2535_v62  ;;  %v2536_v20 = vmax.f32 %v2504_v2, 0.0  ;;  %v3297_v25 = vpop.f32.mrb[4].mxu0 }
 0x1e3   : > { %2570 = vst [vmem:[%s4647_s9 + $0x18] sm:$0xff] %v2538_v50  ;;  %v3329_v35 = vadd.f32 %v3297_v25, %v3127_v40  ;;  %v2353_v23 = vpop.f32.mrb[5].mxu0 }
 0x1e4   : > { %2568 = vst [vmem:[%s4647_s9 + $0x8] sm:$0xff] %v2536_v20  ;;  %v3330_v10 = vadd.f32 %v2353_v23, %v1309_v4  ;;  %v3298_v36 = vpop.f32.mrb[6].mxu0 }
 0x1e5   : > { %v2509_v9 = vadd.f32 %v3329_v35, %v4639_v31  ;;  %v3331_v26 = vadd.f32 %v3298_v36, %v3128_v8  ;;  %v2356_v13 = vpop.f32.mrb[7].mxu0 }
 0x1e6   : > { %v2507_v14 = vadd.f32 %v3330_v10, %v4639_v31  ;;  %v3332_v1 = vadd.f32 %v2356_v13, %v1312_v46 }
 0x1e7   : > { %v2541_v17 = vmax.f32 %v2509_v9, 0.0  ;;  %v2510_v22 = vadd.f32 %v3331_v26, %v4639_v31 }
 0x1e8   : > { %v2539_v18 = vmax.f32 %v2507_v14, 0.0  ;;  %v2508_v24 = vadd.f32 %v3332_v1, %v4639_v31 }
 0x1e9   : > { %2573 = vst [vmem:[%s4647_s9 + $0x30] sm:$0xff] %v2541_v17  ;;  %v2542_v3 = vmax.f32 %v2510_v22, 0.0 }
 0x1ea   : > { %2571 = vst [vmem:[%s4647_s9 + $0x20] sm:$0xff] %v2539_v18  ;;  %v2540_v38 = vmax.f32 %v2508_v24, 0.0  ;;  %v3301_v6 = vpop.f32.mrb[8].mxu0 }
 0x1eb   : > { %2574 = vst [vmem:[%s4647_s9 + $0x38] sm:$0xff] %v2542_v3  ;;  %v3333_v7 = vadd.f32 %v3301_v6, %v3131_v33  ;;  %v2369_v5 = vpop.f32.mrb[9].mxu0 }
 0x1ec   : > { %2572 = vst [vmem:[%s4647_s9 + $0x28] sm:$0xff] %v2540_v38  ;;  %v3334_v53 = vadd.f32 %v2369_v5, %v1325_v32  ;;  %v3302_v54 = vpop.f32.mrb[10].mxu0 }
 0x1ed   : > { %v2513_v61 = vadd.f32 %v3333_v7, %v4639_v31  ;;  %v3335_v11 = vadd.f32 %v3302_v54, %v3132_v56  ;;  %v2372_v28 = vpop.f32.mrb[11].mxu0 }
 0x1ee   : > { %v2511_v37 = vadd.f32 %v3334_v53, %v4639_v31  ;;  %v3336_v15 = vadd.f32 %v2372_v28, %v1328_v52 }
 0x1ef   : > { %v2545_v60 = vmax.f32 %v2513_v61, 0.0  ;;  %v2514_v45 = vadd.f32 %v3335_v11, %v4639_v31 }
 0x1f0   : > { %v2543_v41 = vmax.f32 %v2511_v37, 0.0  ;;  %v2512_v34 = vadd.f32 %v3336_v15, %v4639_v31 }
 0x1f1   : > { %2577 = vst [vmem:[%s4647_s9 + $0x50] sm:$0xff] %v2545_v60  ;;  %v2546_v63 = vmax.f32 %v2514_v45, 0.0 }
 0x1f2   : > { %2575 = vst [vmem:[%s4647_s9 + $0x40] sm:$0xff] %v2543_v41  ;;  %v2544_v43 = vmax.f32 %v2512_v34, 0.0  ;;  %v3305_v16 = vpop.f32.mrb[12].mxu0 }
 0x1f3   : > { %2578 = vst [vmem:[%s4647_s9 + $0x58] sm:$0xff] %v2546_v63  ;;  %v3337_v44 = vadd.f32 %v3305_v16, %v4627_v58  ;;  %v2385_v57 = vpop.f32.mrb[13].mxu0 }
 0x1f4   : > { %2576 = vst [vmem:[%s4647_s9 + $0x48] sm:$0xff] %v2544_v43  ;;  %v3338_v40 = vadd.f32 %v2385_v57, %v4629_v55  ;;  %v3306_v4 = vpop.f32.mrb[14].mxu0 }
 0x1f5   : > { %v2517_v8 = vadd.f32 %v3337_v44, %v4639_v31  ;;  %v3339_v46 = vadd.f32 %v3306_v4, %v4631_v30  ;;  %v2388_v33 = vpop.f32.mrb[15].mxu0 }
 0x1f6   : > { %v2515_v32 = vadd.f32 %v3338_v40, %v4639_v31  ;;  %v3340_v56 = vadd.f32 %v2388_v33, %v4633_v49 }
 0x1f7   : > { %v2549_v52 = vmax.f32 %v2517_v8, 0.0  ;;  %v2518_v58 = vadd.f32 %v3339_v46, %v4639_v31 }
 0x1f8   : > { %v3173_v27 = vpop.f32.mrb[16].mxu1  ;;  %v2547_v12 = vmax.f32 %v2515_v32, 0.0  ;;  %v2516_v55 = vadd.f32 %v3340_v56, %v4639_v31 }
 0x1f9   : > { %v1569_v42 = vpop.f32.mrb[17].mxu1  ;;  %2581 = vst [vmem:[%s4647_s9 + $0x70] sm:$0xff] %v2549_v52  ;;  %v2550_v59 = vmax.f32 %v2518_v58, 0.0 }
 0x1fa   : > { %v3174_v51 = vpop.f32.mrb[18].mxu1  ;;  %2579 = vst [vmem:[%s4647_s9 + $0x60] sm:$0xff] %v2547_v12  ;;  %v2548_v30 = vmax.f32 %v2516_v55, 0.0  ;;  %v3309_v19 = vpop.f32.mrb[16].mxu0 }
 0x1fb   : > { %v1572_v29 = vpop.f32.mrb[19].mxu1  ;;  %2582 = vst [vmem:[%s4647_s9 + $0x78] sm:$0xff] %v2550_v59  ;;  %v3341_v39 = vadd.f32 %v3309_v19, %v3173_v27  ;;  %v2401_v49 = vpop.f32.mrb[17].mxu0 }
 0x1fc   : > { %2580 = vst [vmem:[%s4647_s9 + $0x68] sm:$0xff] %v2548_v30  ;;  %v3342_v0 = vadd.f32 %v2401_v49, %v1569_v42  ;;  %v3310_v48 = vpop.f32.mrb[18].mxu0 }
 0x1fd   : > { %v2521_v47 = vadd.f32 %v3341_v39, %v4639_v31  ;;  %v3343_v21 = vadd.f32 %v3310_v48, %v3174_v51  ;;  %v2404_v62 = vpop.f32.mrb[19].mxu0 }
 0x1fe   : > { %v2519_v2 = vadd.f32 %v3342_v0, %v4639_v31  ;;  %v3344_v50 = vadd.f32 %v2404_v62, %v1572_v29 }
 0x1ff   : > { %v2553_v20 = vmax.f32 %v2521_v47, 0.0  ;;  %v2522_v25 = vadd.f32 %v3343_v21, %v4639_v31 }
 0x200   : > { %v3177_v35 = vpop.f32.mrb[20].mxu1  ;;  %v2551_v23 = vmax.f32 %v2519_v2, 0.0  ;;  %v2520_v10 = vadd.f32 %v3344_v50, %v4639_v31 }
 0x201   : > { %v1585_v36 = vpop.f32.mrb[21].mxu1  ;;  %2585 = vst [vmem:[%s4647_s9 + $0x90] sm:$0xff] %v2553_v20  ;;  %v2554_v9 = vmax.f32 %v2522_v25, 0.0 }
 0x202   : > { %v3178_v26 = vpop.f32.mrb[22].mxu1  ;;  %2583 = vst [vmem:[%s4647_s9 + $0x80] sm:$0xff] %v2551_v23  ;;  %v2552_v13 = vmax.f32 %v2520_v10, 0.0  ;;  %v3313_v14 = vpop.f32.mrb[20].mxu0 }
 0x203   : > { %v1588_v1 = vpop.f32.mrb[23].mxu1  ;;  %2586 = vst [vmem:[%s4647_s9 + $0x98] sm:$0xff] %v2554_v9  ;;  %v3345_v17 = vadd.f32 %v3313_v14, %v3177_v35  ;;  %v2417_v22 = vpop.f32.mrb[21].mxu0 }
 0x204   : > { %2584 = vst [vmem:[%s4647_s9 + $0x88] sm:$0xff] %v2552_v13  ;;  %v3346_v18 = vadd.f32 %v2417_v22, %v1585_v36  ;;  %v3314_v24 = vpop.f32.mrb[22].mxu0 }
 0x205   : > { %v2525_v3 = vadd.f32 %v3345_v17, %v4639_v31  ;;  %v3347_v38 = vadd.f32 %v3314_v24, %v3178_v26  ;;  %v2420_v6 = vpop.f32.mrb[23].mxu0 }
 0x206   : > { %v2523_v7 = vadd.f32 %v3346_v18, %v4639_v31  ;;  %v3348_v5 = vadd.f32 %v2420_v6, %v1588_v1 }
 0x207   : > { %v2557_v53 = vmax.f32 %v2525_v3, 0.0  ;;  %v2526_v54 = vadd.f32 %v3347_v38, %v4639_v31 }
 0x208   : > { %v3181_v61 = vpop.f32.mrb[24].mxu1  ;;  %v2555_v11 = vmax.f32 %v2523_v7, 0.0  ;;  %v2524_v28 = vadd.f32 %v3348_v5, %v4639_v31 }
 0x209   : > { %v1601_v37 = vpop.f32.mrb[25].mxu1  ;;  %2589 = vst [vmem:[%s4647_s9 + $0xb0] sm:$0xff] %v2557_v53  ;;  %v2558_v15 = vmax.f32 %v2526_v54, 0.0 }
 0x20a   : > { %v3182_v60 = vpop.f32.mrb[26].mxu1  ;;  %2587 = vst [vmem:[%s4647_s9 + $0xa0] sm:$0xff] %v2555_v11  ;;  %v2556_v45 = vmax.f32 %v2524_v28, 0.0  ;;  %v3317_v41 = vpop.f32.mrb[24].mxu0 }
 0x20b   : > { %v1604_v34 = vpop.f32.mrb[27].mxu1  ;;  %2590 = vst [vmem:[%s4647_s9 + $0xb8] sm:$0xff] %v2558_v15  ;;  %v3349_v63 = vadd.f32 %v3317_v41, %v3181_v61  ;;  %v2433_v43 = vpop.f32.mrb[25].mxu0 }
 0x20c   : > { %2588 = vst [vmem:[%s4647_s9 + $0xa8] sm:$0xff] %v2556_v45  ;;  %v3350_v16 = vadd.f32 %v2433_v43, %v1601_v37  ;;  %v3318_v44 = vpop.f32.mrb[26].mxu0 }
 0x20d   : > { %v2529_v57 = vadd.f32 %v3349_v63, %v4639_v31  ;;  %v3351_v40 = vadd.f32 %v3318_v44, %v3182_v60  ;;  %v2436_v4 = vpop.f32.mrb[27].mxu0 }
 0x20e   : > { %v2527_v8 = vadd.f32 %v3350_v16, %v4639_v31  ;;  %v3352_v46 = vadd.f32 %v2436_v4, %v1604_v34 }
 0x20f   : > { %v2561_v33 = vmax.f32 %v2529_v57, 0.0  ;;  %v2530_v32 = vadd.f32 %v3351_v40, %v4639_v31 }
 0x210   : > { %v3185_v56 = vpop.f32.mrb[28].mxu1  ;;  %v2559_v52 = vmax.f32 %v2527_v8, 0.0  ;;  %v2528_v58 = vadd.f32 %v3352_v46, %v4639_v31 }
 0x211   : > { %v1617_v27 = vpop.f32.mrb[29].mxu1  ;;  %2593 = vst [vmem:[%s4647_s9 + $0xd0] sm:$0xff] %v2561_v33  ;;  %v2562_v12 = vmax.f32 %v2530_v32, 0.0 }
 0x212   : > { %v3186_v55 = vpop.f32.mrb[30].mxu1  ;;  %2591 = vst [vmem:[%s4647_s9 + $0xc0] sm:$0xff] %v2559_v52  ;;  %v2560_v42 = vmax.f32 %v2528_v58, 0.0  ;;  %v3321_v59 = vpop.f32.mrb[28].mxu0 }
 0x213   : > { %v1620_v51 = vpop.f32.mrb[31].mxu1  ;;  %2594 = vst [vmem:[%s4647_s9 + $0xd8] sm:$0xff] %v2562_v12  ;;  %v3353_v30 = vadd.f32 %v3321_v59, %v3185_v56  ;;  %v2449_v19 = vpop.f32.mrb[29].mxu0 }
 0x214   : > { %2592 = vst [vmem:[%s4647_s9 + $0xc8] sm:$0xff] %v2560_v42  ;;  %v3354_v29 = vadd.f32 %v2449_v19, %v1617_v27  ;;  %v3322_v39 = vpop.f32.mrb[30].mxu0 }
 0x215   : > { %v2533_v49 = vadd.f32 %v3353_v30, %v4639_v31  ;;  %v3355_v0 = vadd.f32 %v3322_v39, %v3186_v55  ;;  %v2452_v48 = vpop.f32.mrb[31].mxu0 }
 0x216   : > { %v2531_v47 = vadd.f32 %v3354_v29, %v4639_v31  ;;  %v3356_v21 = vadd.f32 %v2452_v48, %v1620_v51 }
 0x217   : > { %v2565_v62 = vmax.f32 %v2533_v49, 0.0  ;;  %v2534_v2 = vadd.f32 %v3355_v0, %v4639_v31 }
 0x218   : > { %v2563_v50 = vmax.f32 %v2531_v47, 0.0  ;;  %v2532_v20 = vadd.f32 %v3356_v21, %v4639_v31 }
 0x219   : > { %2597 = vst [vmem:[%s4647_s9 + $0xf0] sm:$0xff] %v2565_v62  ;;  %v2566_v25 = vmax.f32 %v2534_v2, 0.0 }
 0x21a   : > { %2595 = vst [vmem:[%s4647_s9 + $0xe0] sm:$0xff] %v2563_v50  ;;  %v2564_v35 = vmax.f32 %v2532_v20, 0.0 }
 0x21b   : > { %2598 = vst [vmem:[%s4647_s9 + $0xf8] sm:$0xff] %v2566_v25 }
 0x21c   : > { %2596 = vst [vmem:[%s4647_s9 + $0xe8] sm:$0xff] %v2564_v35 }
 0x21d   : > { %3662 = shalt.err (!%p3659_p5)
}
 0x21e   : > { %s3663_s29 = scalar_lea.hbm %s4715_s21, 4096  ;;  %s3667_s5 = scalar_lea.hbm %s4773_s3, 8192 }
 0x21f   : > { %p3664_p6 = scmp.ne.s32.totalorder %s4715_s21, %s3663_s29  ;;  %p3668_p10 = scmp.lt.u32.totalorder %s4715_s21, %s4773_s3 }
 0x220   : > { %p3669_p11 = scmp.lt.u32.totalorder %s3667_s5, %s3663_s29  ;;  %p3671_p13 = scmp.lt.u32.totalorder %s3663_s29, %s4715_s21 }
 0x221   : > { %p3665_p7 = pnand %p3664_p6, %p3792_p4 }
 0x222   : > { %p3670_p12 = por %p3669_p11, %p3668_p10 }
 0x223   : > { %p3666_p9 = pneg %p3665_p7 }
 0x224   : > { %p3672_p0 = por %p3671_p13, %p3670_p12 }
 0x226   : > { %p3673_p1 = pnand %p3672_p0, %p3666_p9 }
 0x228   : > { %3676 = shalt.err (!%p3673_p1)
}
 0x229   : > { %s3730_s8 = smov 128   ;;  %s3731_s9 = smov 8  }
 0x22a   : > { %3592 = dma.vmem_to_hbm [thread:$0]  (%p3792_p4), %s4717_s11, 4096, %s4715_s21, %s4724_s15, %s3730_s8, %s3730_s8, %s3731_s9  }
 0x22b PF: > { %p3598_p2 = scmp.ge.s32.totalorder %s3727_s17, 2  ;;  %s2631_s10 = sand.u32 1, %s3707_s12  }
 0x22c   : > { %s2632_s18 = scalar_lea.sflag [#allocation3], %s2631_s10 }
 0x22d   : > { %p3595_p3 = pnand %p3598_p2, %p3799_p8 }
 0x22f   : > { %3702 = dma.done.wait (!%p3595_p3), %s2632_s18, 4096  }
 0x230   : > { %3704 = vsyncadd (!%p3595_p3), %s2632_s18, 4294963200  ;;  %s16_s17 = sadd.s32 1, %s3727_s17   ;;  %s4835_s12 = smov %s3711_s13 }
 0x231   : > { %p13_p5 = scmp.ge.s32.totalorder %s16_s17, 4   ;;  %s4836_s13 = smov %s3715_s14 }
 0x232   : > { %s4837_s14 = smov %s3805_s25  ;;  %s4838_s15 = smov %s3723_s16 }
 0x233   : > { %s4839_s16 = smov %s4841_s20  ;;  %15 = sbr.rel (!%p13_p5) target bundleno = 4 (0x4), region = 75 }
 0x23a   :  { %2637 = vsyncpa [#allocation3], 1 }
 0x23b   :  { %2639 = vsyncpa [#allocation3 + $0x1], 1 }

</bundles_post_ra>
